<compile_context>
chip_gen: v5e
topology: v5e:2x2
jax: 0.10.0
libtpu: 0.0.40
codegen_flags: <defaults>
</compile_context>

<pallas_src>
import functools
import numpy as np
import jax
import jax.numpy as jnp
from jax.experimental import pallas as pl
from jax.experimental.pallas import tpu as pltpu

# ----------------------------------------------------------------------------
# Haar filters (pywt 'haar'): dec_lo = [s, s], dec_hi = [-s, s],  s = 1/sqrt(2)
# DWPT uses the reversed decomposition filters, IDWPT uses them un-reversed.
# ----------------------------------------------------------------------------
_S2 = 1.0 / np.sqrt(2.0)
W_LO_D = np.array([_S2, _S2], np.float32)    # dec_lo[::-1]
W_HI_D = np.array([_S2, -_S2], np.float32)   # dec_hi[::-1]
W_LO_I = np.array([_S2, _S2], np.float32)    # dec_lo
W_HI_I = np.array([-_S2, _S2], np.float32)   # dec_hi


def _dwt_mat(lin, w):
    # conv1d(k=2, stride=2):  out = x @ T,  T: (lin, lin//2)
    t = np.zeros((lin, lin // 2), np.float32)
    for n in range(lin // 2):
        t[2 * n, n] = w[0]
        t[2 * n + 1, n] = w[1]
    return t


def _up_mat(lin, w):
    # conv_transpose1d(k=2, stride=2):  out = x @ U,  U: (lin, 2*lin)
    u = np.zeros((lin, 2 * lin), np.float32)
    for n in range(lin):
        u[n, 2 * n] = w[0]
        u[n, 2 * n + 1] = w[1]
    return u


def build_dwt_matrix(L):
    t1_lo, t1_hi = _dwt_mat(L, W_LO_D), _dwt_mat(L, W_HI_D)
    t2_lo, t2_hi = _dwt_mat(L // 2, W_LO_D), _dwt_mat(L // 2, W_HI_D)
    # columns grouped per band: [lolo | lohi | hilo | hihi]   -> (L, L)
    return np.concatenate(
        [t1_lo @ t2_lo, t1_lo @ t2_hi, t1_hi @ t2_lo, t1_hi @ t2_hi], axis=1)


def build_idwt_matrix(L):
    u1_lo, u1_hi = _up_mat(L // 4, W_LO_I), _up_mat(L // 4, W_HI_I)
    u2_lo, u2_hi = _up_mat(L // 2, W_LO_I), _up_mat(L // 2, W_HI_I)
    # rows grouped per band: [lolo; lohi; hilo; hihi]         -> (L, L)
    return np.concatenate(
        [u1_lo @ u2_lo, u1_hi @ u2_lo, u1_lo @ u2_hi, u1_hi @ u2_hi], axis=0)


# ----------------------------------------------------------------------------
# Fused Pallas kernel: one grid step == one batch element.
# ----------------------------------------------------------------------------
def _wave_attention_kernel(x_ref, wq_ref, bq_ref, wr_ref, br_ref, t_ref,
                           wf_ref, bf_ref, rt_ref, lng_ref, lnb_ref,
                           wk_ref, bk_ref, wv_ref, bv_ref,
                           wpa_ref, wpi_ref, bp_ref, o_ref, *, num_heads):
    f32 = jnp.float32
    cdt = wq_ref.dtype                 # MXU operand dtype (f32 or bf16)
    N = x_ref.shape[1]
    C = bf_ref.shape[0]
    C4 = wpi_ref.shape[0]
    L = N
    L4 = L // 4
    hd = C // num_heads

    x = x_ref[0]                       # (N, C)  f32
    xc = x.astype(cdt)

    # ---- reduce: 1x1 conv (BN1 folded) + ReLU, NCL layout -> (C4, L) --------
    r = jax.lax.dot_general(wr_ref[...], xc, (((1,), (1,)), ((), ())),
                            preferred_element_type=f32)
    r = jnp.maximum(r + br_ref[...], 0.0).astype(cdt)

    # ---- 2-level Haar DWPT: ONE K=L matmul, columns grouped per band --------
    g = jnp.dot(r, t_ref[...], preferred_element_type=f32)       # (C4, L) f32
    # relayout to torch channel-stacked layout: band j -> rows [j*C4,(j+1)*C4)
    x_dwt = jnp.concatenate([g[:, j * L4:(j + 1) * L4] for j in range(4)],
                            axis=0)                               # (C, L4) f32

    # ---- +-1 shifted copies (zero padded) built off the MXU ----------------
    zcol = jnp.zeros((C, 1), f32)
    sh_r = jnp.concatenate([zcol, x_dwt[:, :L4 - 1]], axis=1)     # in[l-1]
    sh_l = jnp.concatenate([x_dwt[:, 1:], zcol], axis=1)          # in[l+1]
    stacked = jnp.concatenate([sh_r, x_dwt, sh_l], axis=0)        # (3C, L4)

    # ---- 3-tap filter conv (BN2 folded) + ReLU as ONE K=3C matmul -----------
    x_f = jnp.dot(wf_ref[...], stacked.astype(cdt),
                  preferred_element_type=f32)
    x_f = jnp.maximum(x_f + bf_ref[...], 0.0)                     # (C, L4) f32

    # ---- LayerNorm over channels (per length position); stats in f32 --------
    mu = jnp.mean(x_f, axis=0, keepdims=True)
    xm = x_f - mu
    var = jnp.mean(xm * xm, axis=0, keepdims=True)
    kvn = (xm * jax.lax.rsqrt(var + 1e-5) * lng_ref[...]
           + lnb_ref[...]).astype(cdt)                            # (C, M)

    # ---- K/V projections hoisted out of the head loop (K=C matmuls) ---------
    kT = jnp.dot(wk_ref[...], kvn, preferred_element_type=f32) + bk_ref[...]
    vT = jnp.dot(wv_ref[...], kvn, preferred_element_type=f32) + bv_ref[...]

    # ---- Q projection (attention scale folded), full width ------------------
    q = jnp.dot(xc, wq_ref[...], preferred_element_type=f32) + bq_ref[...]

    # ---- per-head attention on static slices; results lane-concatenated -----
    o_heads = []
    for h in range(num_heads):
        sl = slice(h * hd, (h + 1) * hd)
        s = jnp.dot(q[:, sl].astype(cdt), kT[sl, :].astype(cdt),
                    preferred_element_type=f32)                   # (N, M)
        m = jnp.max(s, axis=-1, keepdims=True)
        p = jnp.exp(s - m)
        p = p * pl.reciprocal(jnp.sum(p, axis=-1, keepdims=True), approx=True)
        o_h = jax.lax.dot_general(p.astype(cdt), vT[sl, :].astype(cdt),
                                  (((1,), (1,)), ((), ())),
                                  preferred_element_type=f32)     # (N, hd)
        o_heads.append(o_h)
    o_all = jnp.concatenate(o_heads, axis=1).astype(cdt)          # (N, C)

    # ---- output projection: attention half, one K=C matmul ------------------
    out = jnp.dot(o_all, wpa_ref[...], preferred_element_type=f32) + bp_ref[...]

    # ---- IDWPT as ONE K=L matmul, fused with its slice of the projection ----
    x_bands = jnp.concatenate([x_f[j * C4:(j + 1) * C4, :] for j in range(4)],
                              axis=1).astype(cdt)                 # (C4, L)
    xi_t = jax.lax.dot_general(rt_ref[...], x_bands, (((1,), (1,)), ((), ())),
                               preferred_element_type=f32)        # (N, C4)
    out = out + jnp.dot(xi_t.astype(cdt), wpi_ref[...],
                        preferred_element_type=f32)

    o_ref[0] = out.astype(o_ref.dtype)


# ----------------------------------------------------------------------------
# Parameter prep: fold BN / attention scale into weights, build the wavelet
# matrices and the stacked 3-tap filter weight.  Done once, host side.
# ----------------------------------------------------------------------------
def prepare_params(p, C, L, num_heads, compute_dtype=jnp.float32):
    H = num_heads
    hd = C // H
    C4 = C // 4
    scale = hd ** (-0.5)
    cdt = compute_dtype
    f32 = jnp.float32

    # q projection with attention scale folded in
    wq = (p["wq"] * scale).astype(cdt)                            # (C, C)
    bq = (p["bq"] * scale).reshape(1, C).astype(f32)

    # reduce 1x1 conv with BN1 folded
    wr = (p["bn1_scale"][:, None] * p["wr"]).astype(cdt)          # (C4, C)
    br = (p["bn1_scale"] * p["br"] + p["bn1_shift"]).reshape(C4, 1).astype(f32)

    # full 2-level DWPT matrix (columns grouped per band)
    T = jnp.asarray(build_dwt_matrix(L)).astype(cdt)              # (L, L)

    # filter conv with BN2 folded, taps stacked along the contraction axis
    wf_bn = p["bn2_scale"][None, :, None] * p["wf"]               # (3, C, C)
    wf = jnp.concatenate([wf_bn[0], wf_bn[1], wf_bn[2]], axis=1).astype(cdt)
    bf = (p["bn2_scale"] * p["bf"] + p["bn2_shift"]).reshape(C, 1).astype(f32)

    # full IDWPT matrix (rows grouped per band), pre-transposed: (N, L)
    RT = jnp.asarray(build_idwt_matrix(L)).T.astype(cdt)          # (L, L)

    # LayerNorm params, broadcast over length in NCL layout
    ln_g = p["ln_g"].reshape(C, 1).astype(f32)
    ln_b = p["ln_b"].reshape(C, 1).astype(f32)

    # kv projection: full-width K / V weights, pre-transposed to (C_out, C_in)
    wk = p["wkv"][:, :C].T.astype(cdt)                            # (C, C)
    wv = p["wkv"][:, C:].T.astype(cdt)                            # (C, C)
    bk = p["bkv"][:C].reshape(C, 1).astype(f32)
    bv = p["bkv"][C:].reshape(C, 1).astype(f32)

    # output projection split: attention part (C, C) and idwt part (C4, C)
    wpa = p["wp"][:C].astype(cdt)
    wpi = p["wp"][C:].astype(cdt)
    bp = p["bp"].reshape(1, C).astype(f32)

    return dict(wq=wq, bq=bq, wr=wr, br=br, T=T, wf=wf, bf=bf, RT=RT,
                ln_g=ln_g, ln_b=ln_b, wk=wk, bk=bk, wv=wv, bv=bv,
                wpa=wpa, wpi=wpi, bp=bp)


# ----------------------------------------------------------------------------
# pallas_call wrapper
# ----------------------------------------------------------------------------
def wave_attention_forward(x, L, prepped, num_heads, sr_ratio=1,
                           out_dtype=jnp.float32):
    B, N, C = x.shape
    assert sr_ratio == 1, "kv_embed is nn.Identity only for sr_ratio == 1"
    assert N == L and L % 4 == 0 and C % 4 == 0 and C % num_heads == 0

    q = prepped
    weights = [q["wq"], q["bq"], q["wr"], q["br"], q["T"], q["wf"], q["bf"],
               q["RT"], q["ln_g"], q["ln_b"], q["wk"], q["bk"], q["wv"],
               q["bv"], q["wpa"], q["wpi"], q["bp"]]

    def _full(a):
        nd = a.ndim
        return pl.BlockSpec(a.shape, lambda b, _nd=nd: (0,) * _nd)

    C4 = C // 4
    M = L // 4
    hd = C // num_heads

    # Advisory cost estimate for XLA scheduling around the custom call.
    flops = 2 * B * (C4 * C * N            # reduce
                     + C4 * L * L          # DWPT
                     + C * 3 * C * M       # filter conv
                     + 2 * C * C * M       # K / V projections
                     + N * C * C           # Q projection
                     + num_heads * (N * hd * M + N * M * hd)   # attention
                     + N * C * C           # proj (attention half)
                     + C4 * L * N          # IDWPT
                     + N * C4 * C)         # proj (idwt half)
    weight_bytes = sum(int(np.prod(a.shape)) * a.dtype.itemsize for a in weights)
    io_bytes = (x.size * x.dtype.itemsize
                + B * N * C * jnp.dtype(out_dtype).itemsize)
    cost = pl.CostEstimate(flops=int(flops),
                           transcendentals=int(B * num_heads * N * M),
                           bytes_accessed=int(weight_bytes + io_bytes))

    # Explicit VMEM budget: double-buffered x/out blocks + (conservatively
    # double-buffered) weights + f32 activation / relayout temporaries.
    block_bytes = N * C * (x.dtype.itemsize + jnp.dtype(out_dtype).itemsize)
    act_bytes = 4 * (8 * N * C + 4 * C4 * L + 8 * C * M + 3 * C * M)
    vmem_needed = 2 * weight_bytes + 2 * block_bytes + act_bytes
    vmem_limit = int(min(128 * 1024 * 1024,
                         max(32 * 1024 * 1024, 2 * vmem_needed)))

    return pl.pallas_call(
        functools.partial(_wave_attention_kernel, num_heads=num_heads),
        out_shape=jax.ShapeDtypeStruct((B, N, C), out_dtype),
        grid=(B,),
        in_specs=[pl.BlockSpec((1, N, C), lambda b: (b, 0, 0))]
                 + [_full(a) for a in weights],
        out_specs=pl.BlockSpec((1, N, C), lambda b: (b, 0, 0)),
        compiler_params=pltpu.CompilerParams(
            dimension_semantics=("parallel",),
            vmem_limit_bytes=vmem_limit),
        cost_estimate=cost,
    )(x, *weights)


# ----------------------------------------------------------------------------
# Deterministic parameter initialization (torch-layout raw params)
# ----------------------------------------------------------------------------
def init_params(key, C, L):
    C4 = C // 4
    ks = jax.random.split(key, 22)
    nrm = lambda k, sh, s: jax.random.normal(k, sh, jnp.float32) * s
    p = {}
    p["wq"] = nrm(ks[0], (C, C), 1.0 / np.sqrt(C))
    p["bq"] = nrm(ks[1], (C,), 0.02)
    p["wr"] = nrm(ks[2], (C4, C), 1.0 / np.sqrt(C))
    p["br"] = nrm(ks[3], (C4,), 0.02)
    g1 = 1.0 + 0.1 * jax.random.normal(ks[4], (C4,))
    b1 = 0.1 * jax.random.normal(ks[5], (C4,))
    rm1 = 0.05 * jax.random.normal(ks[6], (C4,))
    rv1 = 1.0 + 0.1 * jax.random.uniform(ks[7], (C4,))
    p["bn1_scale"] = (g1 / jnp.sqrt(rv1 + 1e-5)).astype(jnp.float32)
    p["bn1_shift"] = (b1 - rm1 * p["bn1_scale"]).astype(jnp.float32)
    p["wf"] = nrm(ks[8], (3, C, C), 1.0 / np.sqrt(3 * C))     # (tap, out, in)
    p["bf"] = nrm(ks[9], (C,), 0.02)
    g2 = 1.0 + 0.1 * jax.random.normal(ks[10], (C,))
    b2 = 0.1 * jax.random.normal(ks[11], (C,))
    rm2 = 0.05 * jax.random.normal(ks[12], (C,))
    rv2 = 1.0 + 0.1 * jax.random.uniform(ks[13], (C,))
    p["bn2_scale"] = (g2 / jnp.sqrt(rv2 + 1e-5)).astype(jnp.float32)
    p["bn2_shift"] = (b2 - rm2 * p["bn2_scale"]).astype(jnp.float32)
    p["ln_g"] = (1.0 + 0.1 * jax.random.normal(ks[14], (C,))).astype(jnp.float32)
    p["ln_b"] = (0.1 * jax.random.normal(ks[15], (C,))).astype(jnp.float32)
    p["wkv"] = nrm(ks[16], (C, 2 * C), 1.0 / np.sqrt(C))
    p["bkv"] = nrm(ks[17], (2 * C,), 0.02)
    p["wp"] = nrm(ks[18], (C + C4, C), 1.0 / np.sqrt(C + C4))
    p["bp"] = nrm(ks[19], (C,), 0.02)
    return p


# ----------------------------------------------------------------------------
# Pure-JAX reference (mirrors the PyTorch forward, eval-mode BN)
# ----------------------------------------------------------------------------
def reference_forward(x, L, p, num_heads):
    B, N, C = x.shape
    H = num_heads
    hd = C // H
    L4 = L // 4
    scale = hd ** (-0.5)
    qf = x.reshape(B * N, C) @ p["wq"] + p["bq"]
    q = qf.reshape(B, N, H, hd).transpose(0, 2, 1, 3)
    xc = x.transpose(0, 2, 1)
    r = jnp.einsum("oc,bcl->bol", p["wr"], xc) + p["br"][None, :, None]
    r = jnp.maximum(r * p["bn1_scale"][None, :, None]
                    + p["bn1_shift"][None, :, None], 0.0)
    dwt1 = lambda a, w: w[0] * a[..., 0::2] + w[1] * a[..., 1::2]
    lo, hi = dwt1(r, W_LO_D), dwt1(r, W_HI_D)
    x_dwt = jnp.concatenate([dwt1(lo, W_LO_D), dwt1(lo, W_HI_D),
                             dwt1(hi, W_LO_D), dwt1(hi, W_HI_D)], axis=1)
    xp = jnp.pad(x_dwt, ((0, 0), (0, 0), (1, 1)))
    acc = sum(jnp.einsum("oc,bcl->bol", p["wf"][kk], xp[..., kk:kk + L4])
              for kk in range(3)) + p["bf"][None, :, None]
    x_dwt_f = jnp.maximum(acc * p["bn2_scale"][None, :, None]
                          + p["bn2_shift"][None, :, None], 0.0)

    def up1(a, w):
        return jnp.stack([w[0] * a, w[1] * a], axis=-1).reshape(
            a.shape[0], a.shape[1], -1)

    lolo, lohi, hilo, hihi = jnp.split(x_dwt_f, 4, axis=1)
    x_lo = up1(lolo, W_LO_I) + up1(lohi, W_HI_I)
    x_hi = up1(hilo, W_LO_I) + up1(hihi, W_HI_I)
    x_idwt = up1(x_lo, W_LO_I) + up1(x_hi, W_HI_I)
    x_idwt_t = x_idwt.transpose(0, 2, 1)
    kv_in = x_dwt_f.transpose(0, 2, 1)
    mu = jnp.mean(kv_in, axis=-1, keepdims=True)
    var = jnp.mean((kv_in - mu) ** 2, axis=-1, keepdims=True)
    kv_n = (kv_in - mu) / jnp.sqrt(var + 1e-5) * p["ln_g"] + p["ln_b"]
    kv = kv_n @ p["wkv"] + p["bkv"]
    M = L4
    kv = kv.reshape(B, M, 2, H, hd).transpose(2, 0, 3, 1, 4)
    k, v = kv[0], kv[1]
    attn = jnp.einsum("bhnd,bhmd->bhnm", q, k) * scale
    attn = jax.nn.softmax(attn, axis=-1)
    xo = jnp.einsum("bhnm,bhmd->bhnd", attn, v).transpose(0, 2, 1, 3).reshape(B, N, C)
    return jnp.concatenate([xo, x_idwt_t], axis=-1) @ p["wp"] + p["bp"]


if __name__ == "__main__":
    B, N, C, H = 2, 16, 32, 4          # dim=32, num_heads=4, seq=L=N=16
    L = N
    key = jax.random.PRNGKey(0)
    kx, kp = jax.random.split(key)
    x = jax.random.normal(kx, (B, N, C), jnp.float32)
    params = init_params(kp, C, L)
    ref = reference_forward(x, L, params, num_heads=H)

    # float32 MXU operands: strict check against the pure-JAX reference.
    prepped_f32 = prepare_params(params, C, L, H, jnp.float32)
    out_f32 = wave_attention_forward(x, L, prepped_f32, num_heads=H, sr_ratio=1)
    out_f32 = jax.block_until_ready(out_f32)
    assert out_f32.shape == (B, N, C)
    np.testing.assert_allclose(np.asarray(out_f32), np.asarray(ref),
                               atol=2e-2, rtol=2e-2)

    # bfloat16 MXU operands (f32 accumulation, f32 LN/softmax stats).  Note:
    # pl.reciprocal(approx=True) in the softmax denominator + bf16 P@V make
    # this a deliberately loose check.
    prepped_bf16 = prepare_params(params, C, L, H, jnp.bfloat16)
    out_bf16 = wave_attention_forward(x, L, prepped_bf16, num_heads=H, sr_ratio=1)
    out_bf16 = jax.block_until_ready(out_bf16)
    np.testing.assert_allclose(np.asarray(out_bf16), np.asarray(ref),
                               atol=1e-1, rtol=1e-1)

    print("KERNEL_OK")
</pallas_src>

<mosaic_0001>
module attributes {stable_mosaic.version = 11 : i64} {
  func.func @_wave_attention_kernel(%arg0: i32, %arg1: memref<1x16x32xf32, #tpu.memory_space<vmem>>, %arg2: memref<32x32xf32, #tpu.memory_space<vmem>>, %arg3: memref<1x32xf32, #tpu.memory_space<vmem>>, %arg4: memref<8x32xf32, #tpu.memory_space<vmem>>, %arg5: memref<8x1xf32, #tpu.memory_space<vmem>>, %arg6: memref<16x16xf32, #tpu.memory_space<vmem>>, %arg7: memref<32x96xf32, #tpu.memory_space<vmem>>, %arg8: memref<32x1xf32, #tpu.memory_space<vmem>>, %arg9: memref<16x16xf32, #tpu.memory_space<vmem>>, %arg10: memref<32x1xf32, #tpu.memory_space<vmem>>, %arg11: memref<32x1xf32, #tpu.memory_space<vmem>>, %arg12: memref<32x32xf32, #tpu.memory_space<vmem>>, %arg13: memref<32x1xf32, #tpu.memory_space<vmem>>, %arg14: memref<32x32xf32, #tpu.memory_space<vmem>>, %arg15: memref<32x1xf32, #tpu.memory_space<vmem>>, %arg16: memref<32x32xf32, #tpu.memory_space<vmem>>, %arg17: memref<8x32xf32, #tpu.memory_space<vmem>>, %arg18: memref<1x32xf32, #tpu.memory_space<vmem>>, %arg19: memref<1x16x32xf32, #tpu.memory_space<vmem>>) attributes {dimension_semantics = [#tpu.dimension_semantics<parallel>], iteration_bounds = array<i64: 2>, scalar_prefetch = 0 : i64, scratch_operands = 0 : i64, tpu.core_type = #tpu.core_type<tc>, window_params = [{transform_indices = @transform_0, window_bounds = array<i64: 1, 16, 32>}, {pipeline_mode = #tpu.pipeline_mode<synchronous>, transform_indices = @transform_1, window_bounds = array<i64: 32, 32>}, {pipeline_mode = #tpu.pipeline_mode<synchronous>, transform_indices = @transform_2, window_bounds = array<i64: 1, 32>}, {pipeline_mode = #tpu.pipeline_mode<synchronous>, transform_indices = @transform_3, window_bounds = array<i64: 8, 32>}, {pipeline_mode = #tpu.pipeline_mode<synchronous>, transform_indices = @transform_4, window_bounds = array<i64: 8, 1>}, {pipeline_mode = #tpu.pipeline_mode<synchronous>, transform_indices = @transform_5, window_bounds = array<i64: 16, 16>}, {pipeline_mode = #tpu.pipeline_mode<synchronous>, transform_indices = @transform_6, window_bounds = array<i64: 32, 96>}, {pipeline_mode = #tpu.pipeline_mode<synchronous>, transform_indices = @transform_7, window_bounds = array<i64: 32, 1>}, {pipeline_mode = #tpu.pipeline_mode<synchronous>, transform_indices = @transform_8, window_bounds = array<i64: 16, 16>}, {pipeline_mode = #tpu.pipeline_mode<synchronous>, transform_indices = @transform_9, window_bounds = array<i64: 32, 1>}, {pipeline_mode = #tpu.pipeline_mode<synchronous>, transform_indices = @transform_10, window_bounds = array<i64: 32, 1>}, {pipeline_mode = #tpu.pipeline_mode<synchronous>, transform_indices = @transform_11, window_bounds = array<i64: 32, 32>}, {pipeline_mode = #tpu.pipeline_mode<synchronous>, transform_indices = @transform_12, window_bounds = array<i64: 32, 1>}, {pipeline_mode = #tpu.pipeline_mode<synchronous>, transform_indices = @transform_13, window_bounds = array<i64: 32, 32>}, {pipeline_mode = #tpu.pipeline_mode<synchronous>, transform_indices = @transform_14, window_bounds = array<i64: 32, 1>}, {pipeline_mode = #tpu.pipeline_mode<synchronous>, transform_indices = @transform_15, window_bounds = array<i64: 32, 32>}, {pipeline_mode = #tpu.pipeline_mode<synchronous>, transform_indices = @transform_16, window_bounds = array<i64: 8, 32>}, {pipeline_mode = #tpu.pipeline_mode<synchronous>, transform_indices = @transform_17, window_bounds = array<i64: 1, 32>}, {transform_indices = @transform_18, window_bounds = array<i64: 1, 16, 32>}]} {
    %c0 = arith.constant 0 : index
    %c0_0 = arith.constant 0 : index
    %c0_1 = arith.constant 0 : index
    %0 = vector.load %arg1[%c0, %c0_0, %c0_1] : memref<1x16x32xf32, #tpu.memory_space<vmem>>, vector<1x16x32xf32>
    %1 = vector.shape_cast %0 : vector<1x16x32xf32> to vector<16x32xf32>
    %c0_2 = arith.constant 0 : index
    %c0_3 = arith.constant 0 : index
    %2 = vector.load %arg4[%c0_2, %c0_3] : memref<8x32xf32, #tpu.memory_space<vmem>>, vector<8x32xf32>
    %cst = arith.constant dense<0.000000e+00> : vector<8x16xf32>
    %3 = tpu.matmul %2, %1, %cst {dimension_numbers = #tpu.dot_dimension_numbers<[1], [1], [0], [0], [0, 0, 1, 0], [], []>} : vector<8x32xf32>, vector<16x32xf32>, vector<8x16xf32> -> vector<8x16xf32>
    %c0_4 = arith.constant 0 : index
    %c0_5 = arith.constant 0 : index
    %4 = vector.load %arg5[%c0_4, %c0_5] : memref<8x1xf32, #tpu.memory_space<vmem>>, vector<8x1xf32>
    %5 = vector.broadcast %4 : vector<8x1xf32> to vector<8x16xf32>
    %6 = arith.addf %3, %5 : vector<8x16xf32>
    %cst_6 = arith.constant 0.000000e+00 : f32
    %7 = vector.broadcast %cst_6 : f32 to vector<8x16xf32>
    %8 = arith.maximumf %6, %7 : vector<8x16xf32>
    %c0_7 = arith.constant 0 : index
    %c0_8 = arith.constant 0 : index
    %9 = vector.load %arg6[%c0_7, %c0_8] : memref<16x16xf32, #tpu.memory_space<vmem>>, vector<16x16xf32>
    %cst_9 = arith.constant dense<0.000000e+00> : vector<8x16xf32>
    %10 = tpu.matmul %8, %9, %cst_9 {dimension_numbers = #tpu.dot_dimension_numbers<[1], [0], [0], [1], [0, 0, 1, 1], [], []>} : vector<8x16xf32>, vector<16x16xf32>, vector<8x16xf32> -> vector<8x16xf32>
    %11 = vector.extract_strided_slice %10 {offsets = [0, 0], sizes = [8, 4], strides = [1, 1]} : vector<8x16xf32> to vector<8x4xf32>
    %12 = vector.extract_strided_slice %10 {offsets = [0, 4], sizes = [8, 4], strides = [1, 1]} : vector<8x16xf32> to vector<8x4xf32>
    %13 = vector.extract_strided_slice %10 {offsets = [0, 8], sizes = [8, 4], strides = [1, 1]} : vector<8x16xf32> to vector<8x4xf32>
    %14 = vector.extract_strided_slice %10 {offsets = [0, 12], sizes = [8, 4], strides = [1, 1]} : vector<8x16xf32> to vector<8x4xf32>
    %15 = tpu.concatenate %11, %12, %13, %14 in 0 : vector<8x4xf32>, vector<8x4xf32>, vector<8x4xf32>, vector<8x4xf32> -> vector<32x4xf32>
    %cst_10 = arith.constant 0.000000e+00 : f32
    %16 = vector.broadcast %cst_10 : f32 to vector<32x1xf32>
    %17 = vector.extract_strided_slice %15 {offsets = [0, 0], sizes = [32, 3], strides = [1, 1]} : vector<32x4xf32> to vector<32x3xf32>
    %18 = tpu.concatenate %16, %17 in 1 : vector<32x1xf32>, vector<32x3xf32> -> vector<32x4xf32>
    %19 = vector.extract_strided_slice %15 {offsets = [0, 1], sizes = [32, 3], strides = [1, 1]} : vector<32x4xf32> to vector<32x3xf32>
    %20 = tpu.concatenate %19, %16 in 1 : vector<32x3xf32>, vector<32x1xf32> -> vector<32x4xf32>
    %21 = tpu.concatenate %18, %15, %20 in 0 : vector<32x4xf32>, vector<32x4xf32>, vector<32x4xf32> -> vector<96x4xf32>
    %c0_11 = arith.constant 0 : index
    %c0_12 = arith.constant 0 : index
    %22 = vector.load %arg7[%c0_11, %c0_12] : memref<32x96xf32, #tpu.memory_space<vmem>>, vector<32x96xf32>
    %cst_13 = arith.constant dense<0.000000e+00> : vector<32x4xf32>
    %23 = tpu.matmul %22, %21, %cst_13 {dimension_numbers = #tpu.dot_dimension_numbers<[1], [0], [0], [1], [0, 0, 1, 1], [], []>} : vector<32x96xf32>, vector<96x4xf32>, vector<32x4xf32> -> vector<32x4xf32>
    %c0_14 = arith.constant 0 : index
    %c0_15 = arith.constant 0 : index
    %24 = vector.load %arg8[%c0_14, %c0_15] : memref<32x1xf32, #tpu.memory_space<vmem>>, vector<32x1xf32>
    %25 = vector.broadcast %24 : vector<32x1xf32> to vector<32x4xf32>
    %26 = arith.addf %23, %25 : vector<32x4xf32>
    %cst_16 = arith.constant 0.000000e+00 : f32
    %27 = vector.broadcast %cst_16 : f32 to vector<32x4xf32>
    %28 = arith.maximumf %26, %27 : vector<32x4xf32>
    %cst_17 = arith.constant dense<0.000000e+00> : vector<4xf32>
    %29 = vector.multi_reduction <add>, %28, %cst_17 [0] : vector<32x4xf32> to vector<4xf32>
    %30 = vector.shape_cast %29 : vector<4xf32> to vector<1x4xf32>
    %cst_18 = arith.constant 3.200000e+01 : f32
    %31 = vector.broadcast %cst_18 : f32 to vector<1x4xf32>
    %32 = arith.divf %30, %31 : vector<1x4xf32>
    %33 = vector.broadcast %32 : vector<1x4xf32> to vector<32x4xf32>
    %34 = arith.subf %28, %33 : vector<32x4xf32>
    %35 = arith.mulf %34, %34 : vector<32x4xf32>
    %cst_19 = arith.constant dense<0.000000e+00> : vector<4xf32>
    %36 = vector.multi_reduction <add>, %35, %cst_19 [0] : vector<32x4xf32> to vector<4xf32>
    %37 = vector.shape_cast %36 : vector<4xf32> to vector<1x4xf32>
    %cst_20 = arith.constant 3.200000e+01 : f32
    %38 = vector.broadcast %cst_20 : f32 to vector<1x4xf32>
    %39 = arith.divf %37, %38 : vector<1x4xf32>
    %cst_21 = arith.constant 9.99999974E-6 : f32
    %40 = vector.broadcast %cst_21 : f32 to vector<1x4xf32>
    %41 = arith.addf %39, %40 : vector<1x4xf32>
    %42 = math.rsqrt %41 : vector<1x4xf32>
    %43 = vector.broadcast %42 : vector<1x4xf32> to vector<32x4xf32>
    %44 = arith.mulf %34, %43 : vector<32x4xf32>
    %c0_22 = arith.constant 0 : index
    %c0_23 = arith.constant 0 : index
    %45 = vector.load %arg10[%c0_22, %c0_23] : memref<32x1xf32, #tpu.memory_space<vmem>>, vector<32x1xf32>
    %46 = vector.broadcast %45 : vector<32x1xf32> to vector<32x4xf32>
    %47 = arith.mulf %44, %46 : vector<32x4xf32>
    %c0_24 = arith.constant 0 : index
    %c0_25 = arith.constant 0 : index
    %48 = vector.load %arg11[%c0_24, %c0_25] : memref<32x1xf32, #tpu.memory_space<vmem>>, vector<32x1xf32>
    %49 = vector.broadcast %48 : vector<32x1xf32> to vector<32x4xf32>
    %50 = arith.addf %47, %49 : vector<32x4xf32>
    %c0_26 = arith.constant 0 : index
    %c0_27 = arith.constant 0 : index
    %51 = vector.load %arg12[%c0_26, %c0_27] : memref<32x32xf32, #tpu.memory_space<vmem>>, vector<32x32xf32>
    %cst_28 = arith.constant dense<0.000000e+00> : vector<32x4xf32>
    %52 = tpu.matmul %51, %50, %cst_28 {dimension_numbers = #tpu.dot_dimension_numbers<[1], [0], [0], [1], [0, 0, 1, 1], [], []>} : vector<32x32xf32>, vector<32x4xf32>, vector<32x4xf32> -> vector<32x4xf32>
    %c0_29 = arith.constant 0 : index
    %c0_30 = arith.constant 0 : index
    %53 = vector.load %arg13[%c0_29, %c0_30] : memref<32x1xf32, #tpu.memory_space<vmem>>, vector<32x1xf32>
    %54 = vector.broadcast %53 : vector<32x1xf32> to vector<32x4xf32>
    %55 = arith.addf %52, %54 : vector<32x4xf32>
    %c0_31 = arith.constant 0 : index
    %c0_32 = arith.constant 0 : index
    %56 = vector.load %arg14[%c0_31, %c0_32] : memref<32x32xf32, #tpu.memory_space<vmem>>, vector<32x32xf32>
    %cst_33 = arith.constant dense<0.000000e+00> : vector<32x4xf32>
    %57 = tpu.matmul %56, %50, %cst_33 {dimension_numbers = #tpu.dot_dimension_numbers<[1], [0], [0], [1], [0, 0, 1, 1], [], []>} : vector<32x32xf32>, vector<32x4xf32>, vector<32x4xf32> -> vector<32x4xf32>
    %c0_34 = arith.constant 0 : index
    %c0_35 = arith.constant 0 : index
    %58 = vector.load %arg15[%c0_34, %c0_35] : memref<32x1xf32, #tpu.memory_space<vmem>>, vector<32x1xf32>
    %59 = vector.broadcast %58 : vector<32x1xf32> to vector<32x4xf32>
    %60 = arith.addf %57, %59 : vector<32x4xf32>
    %c0_36 = arith.constant 0 : index
    %c0_37 = arith.constant 0 : index
    %61 = vector.load %arg2[%c0_36, %c0_37] : memref<32x32xf32, #tpu.memory_space<vmem>>, vector<32x32xf32>
    %cst_38 = arith.constant dense<0.000000e+00> : vector<16x32xf32>
    %62 = tpu.matmul %1, %61, %cst_38 {dimension_numbers = #tpu.dot_dimension_numbers<[1], [0], [0], [1], [0, 0, 1, 1], [], []>} : vector<16x32xf32>, vector<32x32xf32>, vector<16x32xf32> -> vector<16x32xf32>
    %c0_39 = arith.constant 0 : index
    %c0_40 = arith.constant 0 : index
    %63 = vector.load %arg3[%c0_39, %c0_40] : memref<1x32xf32, #tpu.memory_space<vmem>>, vector<1x32xf32>
    %64 = vector.broadcast %63 : vector<1x32xf32> to vector<16x32xf32>
    %65 = arith.addf %62, %64 : vector<16x32xf32>
    %66 = vector.extract_strided_slice %65 {offsets = [0, 0], sizes = [16, 8], strides = [1, 1]} : vector<16x32xf32> to vector<16x8xf32>
    %67 = vector.extract_strided_slice %55 {offsets = [0, 0], sizes = [8, 4], strides = [1, 1]} : vector<32x4xf32> to vector<8x4xf32>
    %cst_41 = arith.constant dense<0.000000e+00> : vector<16x4xf32>
    %68 = tpu.matmul %66, %67, %cst_41 {dimension_numbers = #tpu.dot_dimension_numbers<[1], [0], [0], [1], [0, 0, 1, 1], [], []>} : vector<16x8xf32>, vector<8x4xf32>, vector<16x4xf32> -> vector<16x4xf32>
    %cst_42 = arith.constant dense<0xFF800000> : vector<16xf32>
    %69 = vector.multi_reduction <maximumf>, %68, %cst_42 [1] : vector<16x4xf32> to vector<16xf32>
    %70 = vector.shape_cast %69 : vector<16xf32> to vector<16x1xf32>
    %71 = vector.broadcast %70 : vector<16x1xf32> to vector<16x4xf32>
    %72 = arith.subf %68, %71 : vector<16x4xf32>
    %73 = math.exp %72 : vector<16x4xf32>
    %cst_43 = arith.constant dense<0.000000e+00> : vector<16xf32>
    %74 = vector.multi_reduction <add>, %73, %cst_43 [1] : vector<16x4xf32> to vector<16xf32>
    %75 = vector.shape_cast %74 : vector<16xf32> to vector<16x1xf32>
    %76 = tpu.reciprocal %75 {approx = true} : vector<16x1xf32> -> vector<16x1xf32>
    %77 = vector.broadcast %76 : vector<16x1xf32> to vector<16x4xf32>
    %78 = arith.mulf %73, %77 : vector<16x4xf32>
    %79 = vector.extract_strided_slice %60 {offsets = [0, 0], sizes = [8, 4], strides = [1, 1]} : vector<32x4xf32> to vector<8x4xf32>
    %cst_44 = arith.constant dense<0.000000e+00> : vector<16x8xf32>
    %80 = tpu.matmul %78, %79, %cst_44 {dimension_numbers = #tpu.dot_dimension_numbers<[1], [1], [0], [0], [0, 0, 1, 0], [], []>} : vector<16x4xf32>, vector<8x4xf32>, vector<16x8xf32> -> vector<16x8xf32>
    %81 = vector.extract_strided_slice %65 {offsets = [0, 8], sizes = [16, 8], strides = [1, 1]} : vector<16x32xf32> to vector<16x8xf32>
    %82 = vector.extract_strided_slice %55 {offsets = [8, 0], sizes = [8, 4], strides = [1, 1]} : vector<32x4xf32> to vector<8x4xf32>
    %cst_45 = arith.constant dense<0.000000e+00> : vector<16x4xf32>
    %83 = tpu.matmul %81, %82, %cst_45 {dimension_numbers = #tpu.dot_dimension_numbers<[1], [0], [0], [1], [0, 0, 1, 1], [], []>} : vector<16x8xf32>, vector<8x4xf32>, vector<16x4xf32> -> vector<16x4xf32>
    %cst_46 = arith.constant dense<0xFF800000> : vector<16xf32>
    %84 = vector.multi_reduction <maximumf>, %83, %cst_46 [1] : vector<16x4xf32> to vector<16xf32>
    %85 = vector.shape_cast %84 : vector<16xf32> to vector<16x1xf32>
    %86 = vector.broadcast %85 : vector<16x1xf32> to vector<16x4xf32>
    %87 = arith.subf %83, %86 : vector<16x4xf32>
    %88 = math.exp %87 : vector<16x4xf32>
    %cst_47 = arith.constant dense<0.000000e+00> : vector<16xf32>
    %89 = vector.multi_reduction <add>, %88, %cst_47 [1] : vector<16x4xf32> to vector<16xf32>
    %90 = vector.shape_cast %89 : vector<16xf32> to vector<16x1xf32>
    %91 = tpu.reciprocal %90 {approx = true} : vector<16x1xf32> -> vector<16x1xf32>
    %92 = vector.broadcast %91 : vector<16x1xf32> to vector<16x4xf32>
    %93 = arith.mulf %88, %92 : vector<16x4xf32>
    %94 = vector.extract_strided_slice %60 {offsets = [8, 0], sizes = [8, 4], strides = [1, 1]} : vector<32x4xf32> to vector<8x4xf32>
    %cst_48 = arith.constant dense<0.000000e+00> : vector<16x8xf32>
    %95 = tpu.matmul %93, %94, %cst_48 {dimension_numbers = #tpu.dot_dimension_numbers<[1], [1], [0], [0], [0, 0, 1, 0], [], []>} : vector<16x4xf32>, vector<8x4xf32>, vector<16x8xf32> -> vector<16x8xf32>
    %96 = vector.extract_strided_slice %65 {offsets = [0, 16], sizes = [16, 8], strides = [1, 1]} : vector<16x32xf32> to vector<16x8xf32>
    %97 = vector.extract_strided_slice %55 {offsets = [16, 0], sizes = [8, 4], strides = [1, 1]} : vector<32x4xf32> to vector<8x4xf32>
    %cst_49 = arith.constant dense<0.000000e+00> : vector<16x4xf32>
    %98 = tpu.matmul %96, %97, %cst_49 {dimension_numbers = #tpu.dot_dimension_numbers<[1], [0], [0], [1], [0, 0, 1, 1], [], []>} : vector<16x8xf32>, vector<8x4xf32>, vector<16x4xf32> -> vector<16x4xf32>
    %cst_50 = arith.constant dense<0xFF800000> : vector<16xf32>
    %99 = vector.multi_reduction <maximumf>, %98, %cst_50 [1] : vector<16x4xf32> to vector<16xf32>
    %100 = vector.shape_cast %99 : vector<16xf32> to vector<16x1xf32>
    %101 = vector.broadcast %100 : vector<16x1xf32> to vector<16x4xf32>
    %102 = arith.subf %98, %101 : vector<16x4xf32>
    %103 = math.exp %102 : vector<16x4xf32>
    %cst_51 = arith.constant dense<0.000000e+00> : vector<16xf32>
    %104 = vector.multi_reduction <add>, %103, %cst_51 [1] : vector<16x4xf32> to vector<16xf32>
    %105 = vector.shape_cast %104 : vector<16xf32> to vector<16x1xf32>
    %106 = tpu.reciprocal %105 {approx = true} : vector<16x1xf32> -> vector<16x1xf32>
    %107 = vector.broadcast %106 : vector<16x1xf32> to vector<16x4xf32>
    %108 = arith.mulf %103, %107 : vector<16x4xf32>
    %109 = vector.extract_strided_slice %60 {offsets = [16, 0], sizes = [8, 4], strides = [1, 1]} : vector<32x4xf32> to vector<8x4xf32>
    %cst_52 = arith.constant dense<0.000000e+00> : vector<16x8xf32>
    %110 = tpu.matmul %108, %109, %cst_52 {dimension_numbers = #tpu.dot_dimension_numbers<[1], [1], [0], [0], [0, 0, 1, 0], [], []>} : vector<16x4xf32>, vector<8x4xf32>, vector<16x8xf32> -> vector<16x8xf32>
    %111 = vector.extract_strided_slice %65 {offsets = [0, 24], sizes = [16, 8], strides = [1, 1]} : vector<16x32xf32> to vector<16x8xf32>
    %112 = vector.extract_strided_slice %55 {offsets = [24, 0], sizes = [8, 4], strides = [1, 1]} : vector<32x4xf32> to vector<8x4xf32>
    %cst_53 = arith.constant dense<0.000000e+00> : vector<16x4xf32>
    %113 = tpu.matmul %111, %112, %cst_53 {dimension_numbers = #tpu.dot_dimension_numbers<[1], [0], [0], [1], [0, 0, 1, 1], [], []>} : vector<16x8xf32>, vector<8x4xf32>, vector<16x4xf32> -> vector<16x4xf32>
    %cst_54 = arith.constant dense<0xFF800000> : vector<16xf32>
    %114 = vector.multi_reduction <maximumf>, %113, %cst_54 [1] : vector<16x4xf32> to vector<16xf32>
    %115 = vector.shape_cast %114 : vector<16xf32> to vector<16x1xf32>
    %116 = vector.broadcast %115 : vector<16x1xf32> to vector<16x4xf32>
    %117 = arith.subf %113, %116 : vector<16x4xf32>
    %118 = math.exp %117 : vector<16x4xf32>
    %cst_55 = arith.constant dense<0.000000e+00> : vector<16xf32>
    %119 = vector.multi_reduction <add>, %118, %cst_55 [1] : vector<16x4xf32> to vector<16xf32>
    %120 = vector.shape_cast %119 : vector<16xf32> to vector<16x1xf32>
    %121 = tpu.reciprocal %120 {approx = true} : vector<16x1xf32> -> vector<16x1xf32>
    %122 = vector.broadcast %121 : vector<16x1xf32> to vector<16x4xf32>
    %123 = arith.mulf %118, %122 : vector<16x4xf32>
    %124 = vector.extract_strided_slice %60 {offsets = [24, 0], sizes = [8, 4], strides = [1, 1]} : vector<32x4xf32> to vector<8x4xf32>
    %cst_56 = arith.constant dense<0.000000e+00> : vector<16x8xf32>
    %125 = tpu.matmul %123, %124, %cst_56 {dimension_numbers = #tpu.dot_dimension_numbers<[1], [1], [0], [0], [0, 0, 1, 0], [], []>} : vector<16x4xf32>, vector<8x4xf32>, vector<16x8xf32> -> vector<16x8xf32>
    %126 = tpu.concatenate %80, %95, %110, %125 in 1 : vector<16x8xf32>, vector<16x8xf32>, vector<16x8xf32>, vector<16x8xf32> -> vector<16x32xf32>
    %c0_57 = arith.constant 0 : index
    %c0_58 = arith.constant 0 : index
    %127 = vector.load %arg16[%c0_57, %c0_58] : memref<32x32xf32, #tpu.memory_space<vmem>>, vector<32x32xf32>
    %cst_59 = arith.constant dense<0.000000e+00> : vector<16x32xf32>
    %128 = tpu.matmul %126, %127, %cst_59 {dimension_numbers = #tpu.dot_dimension_numbers<[1], [0], [0], [1], [0, 0, 1, 1], [], []>} : vector<16x32xf32>, vector<32x32xf32>, vector<16x32xf32> -> vector<16x32xf32>
    %c0_60 = arith.constant 0 : index
    %c0_61 = arith.constant 0 : index
    %129 = vector.load %arg18[%c0_60, %c0_61] : memref<1x32xf32, #tpu.memory_space<vmem>>, vector<1x32xf32>
    %130 = vector.broadcast %129 : vector<1x32xf32> to vector<16x32xf32>
    %131 = arith.addf %128, %130 : vector<16x32xf32>
    %132 = vector.extract_strided_slice %28 {offsets = [0, 0], sizes = [8, 4], strides = [1, 1]} : vector<32x4xf32> to vector<8x4xf32>
    %133 = vector.extract_strided_slice %28 {offsets = [8, 0], sizes = [8, 4], strides = [1, 1]} : vector<32x4xf32> to vector<8x4xf32>
    %134 = vector.extract_strided_slice %28 {offsets = [16, 0], sizes = [8, 4], strides = [1, 1]} : vector<32x4xf32> to vector<8x4xf32>
    %135 = vector.extract_strided_slice %28 {offsets = [24, 0], sizes = [8, 4], strides = [1, 1]} : vector<32x4xf32> to vector<8x4xf32>
    %136 = tpu.concatenate %132, %133, %134, %135 in 1 : vector<8x4xf32>, vector<8x4xf32>, vector<8x4xf32>, vector<8x4xf32> -> vector<8x16xf32>
    %c0_62 = arith.constant 0 : index
    %c0_63 = arith.constant 0 : index
    %137 = vector.load %arg9[%c0_62, %c0_63] : memref<16x16xf32, #tpu.memory_space<vmem>>, vector<16x16xf32>
    %cst_64 = arith.constant dense<0.000000e+00> : vector<16x8xf32>
    %138 = tpu.matmul %137, %136, %cst_64 {dimension_numbers = #tpu.dot_dimension_numbers<[1], [1], [0], [0], [0, 0, 1, 0], [], []>} : vector<16x16xf32>, vector<8x16xf32>, vector<16x8xf32> -> vector<16x8xf32>
    %c0_65 = arith.constant 0 : index
    %c0_66 = arith.constant 0 : index
    %139 = vector.load %arg17[%c0_65, %c0_66] : memref<8x32xf32, #tpu.memory_space<vmem>>, vector<8x32xf32>
    %cst_67 = arith.constant dense<0.000000e+00> : vector<16x32xf32>
    %140 = tpu.matmul %138, %139, %cst_67 {dimension_numbers = #tpu.dot_dimension_numbers<[1], [0], [0], [1], [0, 0, 1, 1], [], []>} : vector<16x8xf32>, vector<8x32xf32>, vector<16x32xf32> -> vector<16x32xf32>
    %141 = arith.addf %131, %140 : vector<16x32xf32>
    %c0_68 = arith.constant 0 : index
    %c0_69 = arith.constant 0 : index
    %c0_70 = arith.constant 0 : index
    %142 = vector.load %arg19[%c0_68, %c0_69, %c0_70] : memref<1x16x32xf32, #tpu.memory_space<vmem>>, vector<1x16x32xf32>
    %143 = vector.shape_cast %142 : vector<1x16x32xf32> to vector<16x32xf32>
    %144 = vector.shape_cast %141 : vector<16x32xf32> to vector<1x16x32xf32>
    tpu.vector_store %arg19[%c0_68, %c0_69, %c0_70], %144 {strides = array<i32>} : memref<1x16x32xf32, #tpu.memory_space<vmem>>, vector<1x16x32xf32>,
    return
  }
  func.func @transform_0(%arg0: i32) -> (i32, i32, i32) {
    %c0_i32 = arith.constant 0 : i32
    %c0_i32_0 = arith.constant 0 : i32
    %c0_i32_1 = arith.constant 0 : i32
    return %arg0, %c0_i32, %c0_i32_0 : i32, i32, i32
  }
  func.func @transform_1(%arg0: i32) -> (i32, i32) {
    %c0_i32 = arith.constant 0 : i32
    %c0_i32_0 = arith.constant 0 : i32
    %c0_i32_1 = arith.constant 0 : i32
    return %c0_i32, %c0_i32_0 : i32, i32
  }
  func.func @transform_2(%arg0: i32) -> (i32, i32) {
    %c0_i32 = arith.constant 0 : i32
    %c0_i32_0 = arith.constant 0 : i32
    %c0_i32_1 = arith.constant 0 : i32
    return %c0_i32, %c0_i32_0 : i32, i32
  }
  func.func @transform_3(%arg0: i32) -> (i32, i32) {
    %c0_i32 = arith.constant 0 : i32
    %c0_i32_0 = arith.constant 0 : i32
    %c0_i32_1 = arith.constant 0 : i32
    return %c0_i32, %c0_i32_0 : i32, i32
  }
  func.func @transform_4(%arg0: i32) -> (i32, i32) {
    %c0_i32 = arith.constant 0 : i32
    %c0_i32_0 = arith.constant 0 : i32
    %c0_i32_1 = arith.constant 0 : i32
    return %c0_i32, %c0_i32_0 : i32, i32
  }
  func.func @transform_5(%arg0: i32) -> (i32, i32) {
    %c0_i32 = arith.constant 0 : i32
    %c0_i32_0 = arith.constant 0 : i32
    %c0_i32_1 = arith.constant 0 : i32
    return %c0_i32, %c0_i32_0 : i32, i32
  }
  func.func @transform_6(%arg0: i32) -> (i32, i32) {
    %c0_i32 = arith.constant 0 : i32
    %c0_i32_0 = arith.constant 0 : i32
    %c0_i32_1 = arith.constant 0 : i32
    return %c0_i32, %c0_i32_0 : i32, i32
  }
  func.func @transform_7(%arg0: i32) -> (i32, i32) {
    %c0_i32 = arith.constant 0 : i32
    %c0_i32_0 = arith.constant 0 : i32
    %c0_i32_1 = arith.constant 0 : i32
    return %c0_i32, %c0_i32_0 : i32, i32
  }
  func.func @transform_8(%arg0: i32) -> (i32, i32) {
    %c0_i32 = arith.constant 0 : i32
    %c0_i32_0 = arith.constant 0 : i32
    %c0_i32_1 = arith.constant 0 : i32
    return %c0_i32, %c0_i32_0 : i32, i32
  }
  func.func @transform_9(%arg0: i32) -> (i32, i32) {
    %c0_i32 = arith.constant 0 : i32
    %c0_i32_0 = arith.constant 0 : i32
    %c0_i32_1 = arith.constant 0 : i32
    return %c0_i32, %c0_i32_0 : i32, i32
  }
  func.func @transform_10(%arg0: i32) -> (i32, i32) {
    %c0_i32 = arith.constant 0 : i32
    %c0_i32_0 = arith.constant 0 : i32
    %c0_i32_1 = arith.constant 0 : i32
    return %c0_i32, %c0_i32_0 : i32, i32
  }
  func.func @transform_11(%arg0: i32) -> (i32, i32) {
    %c0_i32 = arith.constant 0 : i32
    %c0_i32_0 = arith.constant 0 : i32
    %c0_i32_1 = arith.constant 0 : i32
    return %c0_i32, %c0_i32_0 : i32, i32
  }
  func.func @transform_12(%arg0: i32) -> (i32, i32) {
    %c0_i32 = arith.constant 0 : i32
    %c0_i32_0 = arith.constant 0 : i32
    %c0_i32_1 = arith.constant 0 : i32
    return %c0_i32, %c0_i32_0 : i32, i32
  }
  func.func @transform_13(%arg0: i32) -> (i32, i32) {
    %c0_i32 = arith.constant 0 : i32
    %c0_i32_0 = arith.constant 0 : i32
    %c0_i32_1 = arith.constant 0 : i32
    return %c0_i32, %c0_i32_0 : i32, i32
  }
  func.func @transform_14(%arg0: i32) -> (i32, i32) {
    %c0_i32 = arith.constant 0 : i32
    %c0_i32_0 = arith.constant 0 : i32
    %c0_i32_1 = arith.constant 0 : i32
    return %c0_i32, %c0_i32_0 : i32, i32
  }
  func.func @transform_15(%arg0: i32) -> (i32, i32) {
    %c0_i32 = arith.constant 0 : i32
    %c0_i32_0 = arith.constant 0 : i32
    %c0_i32_1 = arith.constant 0 : i32
    return %c0_i32, %c0_i32_0 : i32, i32
  }
  func.func @transform_16(%arg0: i32) -> (i32, i32) {
    %c0_i32 = arith.constant 0 : i32
    %c0_i32_0 = arith.constant 0 : i32
    %c0_i32_1 = arith.constant 0 : i32
    return %c0_i32, %c0_i32_0 : i32, i32
  }
  func.func @transform_17(%arg0: i32) -> (i32, i32) {
    %c0_i32 = arith.constant 0 : i32
    %c0_i32_0 = arith.constant 0 : i32
    %c0_i32_1 = arith.constant 0 : i32
    return %c0_i32, %c0_i32_0 : i32, i32
  }
  func.func @transform_18(%arg0: i32) -> (i32, i32, i32) {
    %c0_i32 = arith.constant 0 : i32
    %c0_i32_0 = arith.constant 0 : i32
    %c0_i32_1 = arith.constant 0 : i32
    return %arg0, %c0_i32, %c0_i32_0 : i32, i32, i32
  }
}

</mosaic_0001>

<bundles_post_ra>
// kernel: tpu_custom_call.1
= control target key start
LH: loop header
LB: loop body
LE: loop exit
PB: predicated region body
PF: predicated region fallthrough
CT: control target
= control target key end

     0   :  { %s2663_s0 = inlined_call_operand.vmem [shape: f32[2,16,32], index: 0, kind: input, shape index: {}]   ;;  %s2664_s1 = inlined_call_operand.vmem [shape: f32[32,32], index: 1, kind: input, shape index: {}]   ;;  %s2665_s2 = inlined_call_operand.hbm [shape: f32[1,32], index: 2, kind: input, shape index: {}]   ;;  %s2666_s3 = inlined_call_operand.hbm [shape: f32[8,32], index: 3, kind: input, shape index: {}]   ;;  %s2667_s4 = inlined_call_operand.vmem [shape: f32[8,1], index: 4, kind: input, shape index: {}]   ;;  %s2668_s5 = inlined_call_operand.vmem [shape: f32[16,16], index: 5, kind: input, shape index: {}]   ;;  %s2669_s6 = inlined_call_operand.vmem [shape: f32[32,96], index: 6, kind: input, shape index: {}]   ;;  %s2670_s7 = inlined_call_operand.vmem [shape: f32[32,1], index: 7, kind: input, shape index: {}]   ;;  %s2671_s8 = inlined_call_operand.hbm [shape: f32[16,16], index: 8, kind: input, shape index: {}]   ;;  %s2672_s9 = inlined_call_operand.vmem [shape: f32[32,1], index: 9, kind: input, shape index: {}]   ;;  %s2673_s10 = inlined_call_operand.vmem [shape: f32[32,1], index: 10, kind: input, shape index: {}]   ;;  %s2674_s11 = inlined_call_operand.vmem [shape: f32[32,32], index: 11, kind: input, shape index: {}]   ;;  %s2675_s12 = inlined_call_operand.vmem [shape: f32[32,1], index: 12, kind: input, shape index: {}]   ;;  %s2676_s13 = inlined_call_operand.vmem [shape: f32[32,32], index: 13, kind: input, shape index: {}]   ;;  %s2677_s14 = inlined_call_operand.vmem [shape: f32[32,1], index: 14, kind: input, shape index: {}]   ;;  %s2678_s15 = inlined_call_operand.hbm [shape: f32[32,32], index: 15, kind: input, shape index: {}]   ;;  %s2679_s16 = inlined_call_operand.vmem [shape: f32[8,32], index: 16, kind: input, shape index: {}]   ;;  %s2680_s17 = inlined_call_operand.vmem [shape: f32[1,32], index: 17, kind: input, shape index: {}]   ;;  %s2681_s18 = inlined_call_operand.hbm [shape: f32[2,16,32], index: 18, kind: output, shape index: {}]  }
   0x1   :  { %2693 = sst [smem:[#allocation23_spill]] %s2663_s0 }
   0x2   :  { %2694 = sst [smem:[#allocation24_spill]] %s2664_s1 }
   0x3   :  { %2695 = sst [smem:[#allocation25_spill]] %s2665_s2 }
   0x4   :  { %2696 = sst [smem:[#allocation26_spill]] %s2666_s3 }
   0x5   :  { %2697 = sst [smem:[#allocation27_spill]] %s2680_s17 }
   0x6   :  { %2698 = sst [smem:[#allocation28_spill]] %s2681_s18 }
   0x7   :  { %23 = vsyncpa [#allocation3], 0 }
   0x8   :  { %24 = vsyncpa [#allocation6], 0 }
   0x9   :  { %25 = vsyncpa [#allocation9], 0 }
   0xa   :  { %26 = vsyncpa [#allocation4], 0 }
   0xb   :  { %28 = vsyncpa [#allocation4 + $0x1], 0  ;;  %s2244_s27 = smov 0   ;;  %s2246_s28 = smov 0  }
   0xc   :  { %s2248_s29 = smov 0   ;;  %s2250_s30 = smov 0  }
   0xd LB: > { %2699 = sst [smem:[#allocation15_spill]] %s2114_s27  ;;  %s2265_s0 = sadd.s32 4294967295, %s2126_s30   ;;  %s2126_s30 = sphi %s2250_s30, %s2725_s30   ;;  %s2122_s29 = sphi %s2248_s29, %s2728_s29   ;;  %s2118_s28 = sphi %s2246_s28, %s2727_s28   ;;  %s2114_s27 = sphi %s2244_s27, %s2726_s27  }
   0xe   : > { %2700 = sst [smem:[#allocation16_spill]] %s2118_s28  ;;  %s1715_s19 = sadd.s32 4294967294, %s2126_s30  }
   0xf   : > { %2701 = sst [smem:[#allocation17_spill]] %s2122_s29  ;;  %s2269_s1 = sadd.s32 1, %s2126_s30  }
  0x10   : > { %2702 = sst [smem:[#allocation18_spill]] %s2126_s30  ;;  %s424_s20 = sadd.s32 1, %s2122_s29 }
  0x11   : > { %2703 = sst [smem:[#allocation19_spill]] %s2269_s1  ;;  %s421_s21 = ssub.s32 %s2126_s30, %s2269_s1 }
  0x12   : > { %p434_p0 = scmp.ne.s32.totalorder %s2122_s29, %s2118_s28  ;;  %p422_p1 = scmp.eq.s32.totalorder %s421_s21, 0 }
  0x13   : > { %p435_p2 = scmp.eq.s32.totalorder %s2265_s0, 1  ;;  %p440_p3 = scmp.ne.s32.totalorder %s2118_s28, %s2114_s27 }
  0x14   : > { %p441_p4 = scmp.eq.s32.totalorder %s1715_s19, 1  ;;  %p1716_p7 = scmp.ge.s32.totalorder %s2126_s30, 1 }
  0x15   : > { %s2280_s22 = scalar_select %p422_p1, %s2122_s29, %s424_s20  }
  0x16   : > { %p2282_p5 = por %p435_p2, %p434_p0  ;;  %p2286_p6 = por %p441_p4, %p440_p3 }
  0x17   : > { %2704 = sst [smem:[#allocation20_spill]] %s2280_s22  ;;  %p448_p8 = scmp.lt.s32.totalorder %s2126_s30, 3 }
  0x18   : > { %s2705_s2 = scalar_select %p2282_p5, 1, 0 }
  0x19   : > { %s2707_s23 = scalar_select %p2286_p6, 1, 0 }
  0x1a   : > { %2706 = sst [smem:[#allocation21_spill]] %s2705_s2  ;;  %p1829_p9 = scmp.eq.s32.totalorder %s2265_s0, 0 }
  0x1b   : > { %2708 = sst [smem:[#allocation22_spill]] %s2707_s23  ;;  %p2293_p10 = pnand %p1716_p7, %p448_p8 }
  0x1c   : > { %s2710_s3 = sld [smem:[#allocation26_spill]]  ;;  %s2128_s20 = smov [#allocation5]  }
  0x1d   : > { %p1812_p11 = pneg %p2293_p10  ;;  %s477_s21 = sshll.u32 %s2128_s20, 4  ;;  %s478_s21 = int_to_ptr.vmem [resolvable:$true] %s477_s21 }
  0x1e   : > { %s2711_s1 = sld [smem:[#allocation25_spill]]  ;;  %s2129_s30 = smov [#allocation2]  }
  0x1f   : > { %p2307_p12 = pnand %p1829_p9, %p1812_p11  ;;  %s465_s20 = sshll.u32 %s2129_s30, 4  ;;  %s466_s20 = int_to_ptr.vmem [resolvable:$true] %s465_s20 }
  0x20   : > { %s2130_s29 = smov [#allocation7]   ;;  %s530_s18 = sshll.u32 %s2678_s15, 4  ;;  %s531_s18 = int_to_ptr.hbm [resolvable:$true] %s530_s18 }
  0x21   : > { %s2131_s17 = smov 128   ;;  %s2132_s28 = smov 8  }
  0x22   : > { %s475_s19 = sshll.u32 %s2710_s3, 4  ;;  %s498_s3 = sshll.u32 %s2671_s8, 4  ;;  %s476_s19 = int_to_ptr.hbm [resolvable:$true] %s475_s19  ;;  %s499_s3 = int_to_ptr.hbm [resolvable:$true] %s498_s3 }
  0x23   : > { %1818 = dma.hbm_to_vmem [thread:$0]  (!%p2307_p12), %s476_s19, 128, %s478_s21, [#allocation6]  }
  0x24   : > { %s463_s23 = sshll.u32 %s2711_s1, 4  ;;  %s500_s1 = sshll.u32 %s2130_s29, 4  ;;  %s464_s23 = int_to_ptr.hbm [resolvable:$true] %s463_s23  ;;  %s501_s1 = int_to_ptr.vmem [resolvable:$true] %s500_s1 }
  0x25   : > { %1815 = dma.hbm_to_vmem [thread:$0]  (!%p2307_p12), %s464_s23, 16, %s466_s20, [#allocation3]  }
  0x26   : > { %1821 = dma.hbm_to_vmem [thread:$0]  (!%p2307_p12), %s499_s3, 256, %s501_s1, [#allocation6], %s2131_s17, %s2131_s17, %s2132_s28  }
  0x27   : > { %s2133_s30 = smov [#allocation8]   ;;  %562 = sbr.rel (%p2293_p10) target bundleno = 1792 (0x700), region = 92 }
  0x28   : > { %s532_s25 = sshll.u32 %s2133_s30, 4  ;;  %s533_s25 = int_to_ptr.vmem [resolvable:$true] %s532_s25 }
  0x29   : > { %1824 = dma.hbm_to_vmem [thread:$0]  (!%p2307_p12), %s531_s18, 512, %s533_s25, [#allocation9], %s2131_s17, %s2131_s17, %s2132_s28  }
  0x2c   : > { %2097 = dma.done.wait (%p1829_p9), [#allocation3], 16  }
  0x2d   : > { %2099 = vsyncadd (%p1829_p9), [#allocation3], 4294967280 }
  0x2e   : > { %2101 = dma.done.wait (%p1829_p9), [#allocation6], 384  }
  0x2f   : > { %2103 = vsyncadd (%p1829_p9), [#allocation6], 4294966912 }
  0x30   : > { %2105 = dma.done.wait (%p1829_p9), [#allocation9], 512  }
  0x31   : > { %2107 = vsyncadd (%p1829_p9), [#allocation9], 4294966784  ;;  %p632_p13 = scmp.lt.s32.totalorder %s2265_s0, 1  ;;  %v2134_v0 = vmov 0   ;;  %s2713_s28 = sld [smem:[#allocation23_spill]]  ;;  %vm646_vm0 = vcmask 261120  }
  0x32   : > { %1891 = vset.pattern.permute.xlu0 %v2134_v0  ;;  %1892 = vset.pattern.permute.xlu1 %v2134_v0  ;;  %v640_v2 = vld [vmem:[%s2667_s4] sm:$0xff]  ;;  %v678_v5 = vld [vmem:[%s2668_s5 + $0x8] sm:$0xff]  ;;  %vm679_vm1 = vcmask 130048   ;;  %s2135_s29 = smov 120   ;;  %s2136_s1 = smov 116   ;;  %v754_v20 = vld [vmem:[%s2670_s7 + $0x18] sm:$0xff] }
  0x33   : > { %s633_s3 = scalar_select %p632_p13, %s2265_s0, 1  ;;  %1893 = vset.pattern.permute.xlu2 %v2134_v0  ;;  %643 = vperm.xlu0 %1891, %v640_v2   ;;  %v639_v4 = vld [vmem:[#allocation5] sm:$0xff]  ;;  %v911_v21 = vld [vmem:[%s2673_s10 + $0x18] sm:$0xff]  ;;  %vm742_vm2 = vcmask 23552   ;;  %vm725_vm3 = vcmask 7168   ;;  %v753_v40 = vld [vmem:[%s2670_s7 + $0x10] sm:$0xff] }
  0x34   : > { %v677_v6 = vld [vmem:[%s2668_s5] sm:$0xff]  ;;  %s2137_s22 = smov 124   ;;  %s2138_s30 = smov 127   ;;  %v752_v25 = vld [vmem:[%s2670_s7 + $0x8] sm:$0xff]  ;;  %v883_v27 = vld [vmem:[%s2672_s9 + $0x18] sm:$0xff]  ;;  %vm775_vm5 = vcmask 785408  }
  0x35   : > { %s1792_s17 = sshll.u32 %s633_s3, 4  ;;  %s2139_s23 = smov 1   ;;  %v751_v19 = vld [vmem:[%s2670_s7] sm:$0xff]  ;;  %v881_v28 = vld [vmem:[%s2672_s9 + $0x8] sm:$0xff]  ;;  %vm2413_vm4 = vmneg %vm725_vm3  ;;  %v2141_v58 = vmov 32.0   ;;  %vm821_vm6 = vcmask 31744  }
  0x36   : > { %v880_v22 = vld [vmem:[%s2672_s9] sm:$0xff]  ;;  %v909_v30 = vld [vmem:[%s2673_s10 + $0x8] sm:$0xff]  ;;  %s2140_s27 = smov 112   ;;  %v943_v43 = vld [vmem:[%s2675_s12 + $0x18] sm:$0xff]  ;;  %1896 = vrcp.f32 %v2141_v58  ;;  %s2142_s19 = smov 104   ;;  %vm1105_vm11 = vcmask 64512  }
  0x37   : > { %s636_s2 = scalar_lea.vmem %s2713_s28, %s1792_s17  ;;  %s2714_s17 = sld [smem:[#allocation24_spill]]  ;;  %v940_v23 = vld [vmem:[%s2675_s12] sm:$0xff]  ;;  %v941_v33 = vld [vmem:[%s2675_s12 + $0x8] sm:$0xff]  ;;  %v882_v44 = vld [vmem:[%s2672_s9 + $0x10] sm:$0xff]  ;;  %vm1526_vm12 = vcmask 97280   ;;  %vm1472_vm13 = vcmask 195584  }
  0x38   : > { %v638_v1 = vld [vmem:[%s636_s2 + $0x8] sm:$0xff]  ;;  %v637_v3 = vld [vmem:[%s636_s2] sm:$0xff]  ;;  %v910_v46 = vld [vmem:[%s2673_s10 + $0x10] sm:$0xff]  ;;  %s2145_s25 = smov 8   ;;  %s2146_s3 = smov 16  }
  0x39   : > { %1730 = vmatpush.xpose.msk.msra.mxu0 %vm646_vm0, %v638_v1  ;;  %v2418_v35 = vld [vmem:[#allocation2] ss:$0 sm:$0xff]  ;;  %v748_v45 = vld [vmem:[%s2669_s6 + $0x8] sm:$0xff]  ;;  %v749_v47 = vld [vmem:[%s2669_s6 + $0x10] sm:$0xff]  ;;  %s2147_s18 = smov 24   ;;  %s1793_s26 = sshll.u32 %s2265_s0, 4 }
  0x3a   : > { %v747_v41 = vld [vmem:[%s2669_s6] sm:$0xff]  ;;  %v750_v49 = vld [vmem:[%s2669_s6 + $0x18] sm:$0xff]  ;;  %v942_v50 = vld [vmem:[%s2675_s12 + $0x10] sm:$0xff] }
  0x3b   : > { %v908_v48 = vld [vmem:[%s2673_s10] sm:$0xff] }
  0x3c   : > { %v1897_v0 = vpop.eup %1896 }
  0x3d   : > { %1731 = vmatpush.xpose.msk.msra.mxu0 %vm646_vm0, %v637_v3  ;;  %v1077_v14 = vld [vmem:[%s2714_s17 + $0x18] sm:$0xff]  ;;  %v1076_v15 = vld [vmem:[%s2714_s17 + $0x10] sm:$0xff]  ;;  %v1075_v16 = vld [vmem:[%s2714_s17 + $0x8] sm:$0xff]  ;;  %vm840_vm7 = vweird.f32 %v1897_v0 }
  0x3e   : > { %v1074_v18 = vld [vmem:[%s2714_s17] sm:$0xff] }
  0x40   : > { %1732 = vmatmul.msk.f32.vlgmr.msra.gmra.mxu0 %vm646_vm0, %v639_v4 }
  0x41   : > { %697 = vmatpush.msrb.mxu0 %v678_v5 }
  0x43   : > { %698 = vmatpush.msrb.mxu0 %v677_v6 }
  0x45   : > { %1094 = vmatpush.msra.mxu0 %v1077_v14 }
  0x47   : > { %1095 = vmatpush.msra.mxu0 %v1076_v15 }
  0x49   : > { %1096 = vmatpush.msra.mxu0 %v1075_v16 }
  0x4b   : > { %1097 = vmatpush.msra.mxu0 %v1074_v18 }
  0xa5   : > { %v644_v7 = vpop.permute.xlu0 %643 }
  0xbd   : > { %v673_v8 = vpop.f32.mrf.mxu0 }
  0xbe   : > { %v674_v9 = vadd.f32 %v673_v8, %v644_v7  ;;  %v836_v7 = vmul.f32 32.0, %v1897_v0 }
  0xc0   : > { %v676_v10 = vmax.f32 %v674_v9, 0.0 }
  0xc2   : > { %1733 = vmatmul.msk.f32.vlgmr.msrb.gmra.mxu0 %vm679_vm1, %v676_v10 }
  0xca   : > { %1758 = vmatmul.msk.f32.vlgmr.msra.gmra.mxu0 %vm646_vm0, %v637_v3 }
  0xd2   : > { %1759 = vmatmul.msk.f32.gmra.mxu0 %vm646_vm0, %v638_v1 }
 0x13f   : > { %v2357_v11 = vpop.f32.mrf.mxu0 }
 0x140   : > { %707 = vrot.lane.b32.xlu1 %v2357_v11, %s2135_s29  ;;  %710 = vrot.lane.b32.xlu0 %v2357_v11, %s2136_s1 }
 0x147   : > { %v1099_v36 = vpop.f32.mrf.mxu0 }
 0x148   : > { %704 = vrot.lane.b32.xlu1 %v2357_v11, %s2137_s22  ;;  %v2423_v38 = vadd.f32 %v2418_v35, %v1099_v36  ;;  %s2143_s22 = smov 4  }
 0x150   : > { %730 = vrot.lane.b32.xlu1 %v2357_v11, %s2138_s30 }
 0x1b2   : > { %v708_v12 = vpop.permute.xlu1 %707  ;;  %v711_v13 = vpop.permute.xlu0 %710 }
 0x1b3   : > { %736 = vrot.lane.b32.xlu2 %v711_v13, %s2138_s30 }
 0x1ba   : > { %v705_v17 = vpop.permute.xlu1 %704 }
 0x1bb   : > { %715 = vrot.lane.b32.xlu1 %v705_v17, %s2139_s23  ;;  %732 = vrot.lane.b32.xlu0 %v705_v17, %s2138_s30 }
 0x1bc   : > { %734 = vrot.lane.b32.xlu2 %v708_v12, %s2138_s30  ;;  %s2144_s30 = smov 12  }
 0x1c2   : > { %v731_v31 = vpop.permute.xlu1 %730 }
 0x1c3   : > { %717 = vrot.lane.b32.xlu0 %v708_v12, %s2139_s23  ;;  %762 = vperm.xlu1 %1892, %v752_v25  }
 0x1c4   : > { %719 = vrot.lane.b32.xlu2 %v711_v13, %s2139_s23 }
 0x1cb   : > { %757 = vperm.xlu0 %1891, %v751_v19   ;;  %901 = vperm.xlu1 %1892, %v883_v27  }
 0x1cc   : > { %713 = vrot.lane.b32.xlu2 %v2357_v11, %s2139_s23  ;;  %s2717_s23 = sld [smem:[#allocation16_spill]] }
 0x1d2   : > { %s629_s24 = sand.u32 1, %s2717_s23  }
 0x1d3   : > { %772 = vperm.xlu0 %1891, %v754_v20   ;;  %891 = vperm.xlu1 %1892, %v881_v28   ;;  %s1727_s21 = sshll.u32 %s629_s24, 4  ;;  %s1597_s0 = scalar_lea.sflag [#allocation4], %s629_s24 }
 0x1d4   : > { %767 = vperm.xlu2 %1893, %v753_v40   ;;  %s631_s20 = scalar_lea.vmem [#allocation10], %s1727_s21 }
 0x1d5   : > { %s1609_s2 = sshll.u32 %s631_s20, 4  ;;  %s1610_s2 = int_to_ptr.vmem [resolvable:$true] %s1609_s2 }
 0x1db   : > { %929 = vperm.xlu0 %1891, %v911_v21   ;;  %919 = vperm.xlu1 %1892, %v909_v30  }
 0x1dc   : > { %896 = vperm.xlu2 %1893, %v882_v44  }
 0x1e3   : > { %886 = vperm.xlu0 %1891, %v880_v22   ;;  %951 = vperm.xlu1 %1892, %v941_v33  }
 0x1e4   : > { %924 = vperm.xlu2 %1893, %v910_v46  }
 0x1eb   : > { %946 = vperm.xlu0 %1891, %v940_v23   ;;  %1274 = vrot.lane.b32.xlu1 %v2423_v38, %s2140_s27 }
 0x1ec   : > { %914 = vperm.xlu2 %1893, %v908_v48  }
 0x1f3   : > { %1189 = vrot.lane.b32.xlu0 %v2423_v38, %s2135_s29  ;;  %961 = vperm.xlu1 %1892, %v943_v43  }
 0x1f4   : > { %956 = vperm.xlu2 %1893, %v942_v50  }
 0x20d   : > { %v737_v24 = vpop.permute.xlu2 %736 }
 0x20e   : > { %1734 = vmatpush.msk.msra.mxu2 %vm742_vm2, %v737_v24 }
 0x216   : > { %v735_v26 = vpop.permute.xlu2 %734 }
 0x217   : > { %1735 = vmatpush.msk.msra.mxu2 %vm742_vm2, %v735_v26 }
 0x21e   : > { %v720_v32 = vpop.permute.xlu2 %719 }
 0x226   : > { %v714_v42 = vpop.permute.xlu2 %713 }
 0x22d   : > { %v733_v29 = vpop.permute.xlu0 %732  ;;  %v716_v39 = vpop.permute.xlu1 %715 }
 0x22e   : > { %1736 = vmatpush.msk.msra.mxu2 %vm742_vm2, %v733_v29  ;;  %v768_v56 = vpop.permute.xlu2 %767 }
 0x230   : > { %1737 = vmatpush.msk.msra.mxu2 %vm742_vm2, %v731_v31 }
 0x232   : > { %796 = vmatpush.msra.mxu2 %v711_v13 }
 0x234   : > { %797 = vmatpush.msra.mxu2 %v708_v12  ;;  %v837_v12 = vsub.f32 1.0, %v836_v7 }
 0x235   : > { %v718_v37 = vpop.permute.xlu0 %717  ;;  %v763_v54 = vpop.permute.xlu1 %762 }
 0x236   : > { %798 = vmatpush.msra.mxu2 %v705_v17  ;;  %v838_v15 = vmul.f32 %v1897_v0, %v837_v12 }
 0x238   : > { %799 = vmatpush.msra.mxu2 %v2357_v11  ;;  %v839_v18 = vadd.f32 %v1897_v0, %v838_v15 }
 0x23a   : > { %1739 = vmatpush.msk.msra.mxu2 %vm2413_vm4, %v720_v32  ;;  %v841_v21 = vsel %vm840_vm7, %v1897_v0, %v839_v18  ;;  %v1102_v0 = vpop.f32.mrf.mxu0  ;;  %v1005_v18 = vld [vmem:[%s2676_s13] sm:$0xff] }
 0x23c   : > { %1741 = vmatpush.msk.msra.mxu2 %vm2413_vm4, %v718_v37 }
 0x23d   : > { %v758_v53 = vpop.permute.xlu0 %757 }
 0x23e   : > { %1743 = vmatpush.msk.msra.mxu2 %vm2413_vm4, %v716_v39 }
 0x240   : > { %1745 = vmatpush.msk.msra.mxu2 %vm2413_vm4, %v714_v42 }
 0x241   : > { %1746 = vmatmul.msk.f32.vlgmr.msra.gmra.mxu2 %vm775_vm5, %v747_v41 }
 0x245   : > { %v773_v2 = vpop.permute.xlu0 %772 }
 0x249   : > { %1747 = vmatmul.msk.f32.gmra.mxu2 %vm775_vm5, %v748_v45 }
 0x251   : > { %1748 = vmatmul.msk.f32.gmra.mxu2 %vm775_vm5, %v749_v47 }
 0x259   : > { %1749 = vmatmul.msk.f32.gmra.mxu2 %vm775_vm5, %v750_v49  ;;  %v902_v49 = vpop.permute.xlu1 %901 }
 0x2c4   : > { %v805_v51 = vpop.f32.mrf.mxu2 }
 0x2c5   : > { %v806_v59 = vadd.f32 %v805_v51, %v758_v53  ;;  %v897_v51 = vpop.permute.xlu2 %896 }
 0x2c7   : > { %v2471_v62 = vmax.f32 %v806_v59, 0.0 }
 0x2c9   : > { %v822_v4 = vsel %vm821_vm6, %v2471_v62, 0.0 }
 0x2cc   : > { %v808_v52 = vpop.f32.mrf.mxu2 }
 0x2cd   : > { %v809_v55 = vadd.f32 %v808_v52, %v763_v54  ;;  %v925_v59 = vpop.permute.xlu2 %924 }
 0x2cf   : > { %v2469_v61 = vmax.f32 %v809_v55, 0.0  ;;  %v930_v55 = vpop.permute.xlu0 %929 }
 0x2d1   : > { %v823_v1 = vsel %vm821_vm6, %v2469_v61, 0.0 }
 0x2d2   : > { %v824_v8 = vadd.f32 %v823_v1, %v822_v4  ;;  %v1103_v4 = vadd.f32 %v2418_v35, %v1102_v0 }
 0x2d4   : > { %v811_v57 = vpop.f32.mrf.mxu2  ;;  %1276 = vrot.lane.b32.xlu0 %v1103_v4, %s2140_s27  ;;  %1191 = vrot.lane.b32.xlu2 %v1103_v4, %s2135_s29 }
 0x2d5   : > { %v812_v60 = vadd.f32 %v811_v57, %v768_v56  ;;  %v892_v57 = vpop.permute.xlu1 %891 }
 0x2d7   : > { %v2473_v63 = vmax.f32 %v812_v60, 0.0 }
 0x2d9   : > { %v825_v5 = vsel %vm821_vm6, %v2473_v63, 0.0 }
 0x2da   : > { %v826_v10 = vadd.f32 %v825_v5, %v824_v8 }
 0x2dc   : > { %v814_v3 = vpop.f32.mrf.mxu2  ;;  %1361 = vrot.lane.b32.xlu0 %v1103_v4, %s2142_s19  ;;  %1359 = vrot.lane.b32.xlu2 %v2423_v38, %s2142_s19  ;;  %s2718_s19 = sld [smem:[#allocation27_spill]] }
 0x2dd   : > { %v815_v6 = vadd.f32 %v814_v3, %v773_v2 }
 0x2df   : > { %v2481_v9 = vmax.f32 %v815_v6, 0.0 }
 0x2e1   : > { %v827_v11 = vsel %vm821_vm6, %v2481_v9, 0.0 }
 0x2e2   : > { %v828_v13 = vadd.f32 %v827_v11, %v826_v10  ;;  %v887_v11 = vpop.permute.xlu0 %886 }
 0x2e4   : > { %v829_v14 = vrot.slane %v828_v13, 4 }
 0x2e6   : > { %v830_v16 = vadd.f32 %v829_v14, %v828_v13  ;;  %v920_v14 = vpop.permute.xlu1 %919 }
 0x2e8   : > { %v831_v17 = vrot.slane %v830_v16, 2 }
 0x2ea   : > { %v832_v19 = vadd.f32 %v831_v17, %v830_v16  ;;  %v915_v16 = vpop.permute.xlu2 %914  ;;  %v936_v17 = vld [vmem:[%s2674_s11] sm:$0xff] }
 0x2ec   : > { %v833_v20 = vrot.slane %v832_v19, 1 }
 0x2ee   : > { %v834_v22 = vadd.f32 %v833_v20, %v832_v19  ;;  %v937_v19 = vld [vmem:[%s2674_s11 + $0x8] sm:$0xff] }
 0x2ef   : > { %v1006_v20 = vld [vmem:[%s2676_s13 + $0x8] sm:$0xff] }
 0x2f0   : > { %v842_v23 = vmul.f32 %v841_v21, %v834_v22  ;;  %v1007_v22 = vld [vmem:[%s2676_s13 + $0x10] sm:$0xff] }
 0x2f2   : > { %v843_v24 = vsub.f32 %v2471_v62, %v842_v23  ;;  %v844_v25 = vsub.f32 %v2469_v61, %v842_v23  ;;  %v845_v26 = vsub.f32 %v2473_v63, %v842_v23  ;;  %v846_v27 = vsub.f32 %v2481_v9, %v842_v23  ;;  %v939_v23 = vld [vmem:[%s2674_s11 + $0x18] sm:$0xff] }
 0x2f4   : > { %v847_v28 = vmul.f32 %v843_v24, %v843_v24  ;;  %v848_v29 = vmul.f32 %v844_v25, %v844_v25  ;;  %v849_v30 = vmul.f32 %v845_v26, %v845_v26  ;;  %v850_v31 = vmul.f32 %v846_v27, %v846_v27 }
 0x2f6   : > { %v851_v32 = vsel %vm821_vm6, %v847_v28, 0.0  ;;  %v852_v33 = vsel %vm821_vm6, %v848_v29, 0.0  ;;  %v854_v36 = vsel %vm821_vm6, %v849_v30, 0.0  ;;  %v856_v39 = vsel %vm821_vm6, %v850_v31, 0.0  ;;  %v952_v28 = vpop.permute.xlu1 %951  ;;  %v957_v30 = vpop.permute.xlu2 %956 }
 0x2f7   : > { %v853_v34 = vadd.f32 %v852_v33, %v851_v32 }
 0x2f9   : > { %v855_v37 = vadd.f32 %v854_v36, %v853_v34 }
 0x2fb   : > { %v857_v40 = vadd.f32 %v856_v39, %v855_v37 }
 0x2fd   : > { %v858_v41 = vrot.slane %v857_v40, 4 }
 0x2fe   : > { %v1275_v33 = vpop.permute.xlu1 %1274 }
 0x2ff   : > { %v859_v42 = vadd.f32 %v858_v41, %v857_v40 }
 0x301   : > { %v860_v43 = vrot.slane %v859_v42, 2 }
 0x303   : > { %v861_v44 = vadd.f32 %v860_v43, %v859_v42 }
 0x305   : > { %v862_v45 = vrot.slane %v861_v44, 1 }
 0x307   : > { %v863_v46 = vadd.f32 %v862_v45, %v861_v44 }
 0x309   : > { %v864_v47 = vmul.f32 %v863_v46, %v841_v21  ;;  %v938_v21 = vld [vmem:[%s2674_s11 + $0x10] sm:$0xff] }
 0x30b   : > { %v865_v48 = vadd.f32 1e-05, %v864_v47 }
 0x30d   : > { %1898 = vrsqrt.f32 %v865_v48  ;;  %vm872_vm9 = vweird.f32 %v865_v48 }
 0x313   : > { %v1899_v50 = vpop.eup %1898 }
 0x314   : > { %v867_v52 = vmul.f32 %v1899_v50, %v865_v48  ;;  %vm873_vm8 = vweird.f32 %v1899_v50 }
 0x315   : > { %vm874_vm10 = vmor %vm872_vm9, %vm873_vm8 }
 0x316   : > { %v868_v53 = vmul.f32 %v1899_v50, %v867_v52 }
 0x318   : > { %v869_v54 = vmul.f32 0.5, %v868_v53 }
 0x31a   : > { %v870_v56 = vsub.f32 1.5, %v869_v54 }
 0x31c   : > { %v871_v58 = vmul.f32 %v1899_v50, %v870_v56 }
 0x31e   : > { %v875_v60 = vsel %vm874_vm10, %v1899_v50, %v871_v58 }
 0x31f   : > { %v879_v1 = vmul.f32 %v875_v60, %v846_v27  ;;  %v878_v2 = vmul.f32 %v875_v60, %v845_v26  ;;  %v877_v3 = vmul.f32 %v875_v60, %v844_v25  ;;  %v876_v7 = vmul.f32 %v875_v60, %v843_v24  ;;  %v1008_v24 = vld [vmem:[%s2676_s13 + $0x18] sm:$0xff]  ;;  %v947_v25 = vpop.permute.xlu0 %946 }
 0x321   : > { %v907_v5 = vmul.f32 %v902_v49, %v879_v1  ;;  %v906_v6 = vmul.f32 %v897_v51, %v878_v2  ;;  %v905_v10 = vmul.f32 %v892_v57, %v877_v3  ;;  %v904_v13 = vmul.f32 %v887_v11, %v876_v7  ;;  %v1009_v3 = vld [vmem:[%s2677_s14] sm:$0xff] }
 0x323   : > { %v935_v8 = vadd.f32 %v930_v55, %v907_v5  ;;  %v934_v12 = vadd.f32 %v925_v59, %v906_v6  ;;  %v933_v15 = vadd.f32 %v920_v14, %v905_v10  ;;  %v932_v35 = vadd.f32 %v915_v16, %v904_v13 }
 0x325   : > { %988 = vmatpush.msra.mxu3 %v935_v8  ;;  %1057 = vmatpush.msra.mxu1 %v935_v8 }
 0x327   : > { %989 = vmatpush.msra.mxu3 %v934_v12  ;;  %1058 = vmatpush.msra.mxu1 %v934_v12  ;;  %v1190_v32 = vpop.permute.xlu0 %1189 }
 0x329   : > { %990 = vmatpush.msra.mxu3 %v933_v15  ;;  %1059 = vmatpush.msra.mxu1 %v933_v15 }
 0x32b   : > { %991 = vmatpush.msra.mxu3 %v932_v35  ;;  %1060 = vmatpush.msra.mxu1 %v932_v35 }
 0x32c   : > { %1750 = vmatmul.msk.f32.vlgmr.msra.gmra.mxu3 %vm646_vm0, %v936_v17  ;;  %1754 = vmatmul.msk.f32.vlgmr.msra.gmra.mxu1 %vm646_vm0, %v1005_v18 }
 0x32e   : > { %v1192_v36 = vpop.permute.xlu2 %1191 }
 0x334   : > { %1751 = vmatmul.msk.f32.gmra.mxu3 %vm646_vm0, %v937_v19  ;;  %1755 = vmatmul.msk.f32.gmra.mxu1 %vm646_vm0, %v1006_v20 }
 0x336   : > { %v1360_v42 = vpop.permute.xlu2 %1359 }
 0x33c   : > { %1752 = vmatmul.msk.f32.gmra.mxu3 %vm646_vm0, %v938_v21  ;;  %1756 = vmatmul.msk.f32.gmra.mxu1 %vm646_vm0, %v1007_v22 }
 0x344   : > { %1753 = vmatmul.msk.f32.gmra.mxu3 %vm646_vm0, %v939_v23  ;;  %1757 = vmatmul.msk.f32.gmra.mxu1 %vm646_vm0, %v1008_v24 }
 0x346   : > { %v1277_v39 = vpop.permute.xlu0 %1276 }
 0x34e   : > { %v1362_v43 = vpop.permute.xlu0 %1361 }
 0x3a9   : > { %v2538_v44 = vpop.f32.mrf.mxu1 }
 0x3af   : > { %v993_v26 = vpop.f32.mrf.mxu3 }
 0x3b0   : > { %v994_v27 = vadd.f32 %v993_v26, %v947_v25 }
 0x3b1   : > { %v2540_v45 = vpop.f32.mrf.mxu1 }
 0x3b2   : > { %1127 = vmatpush.msrb.mxu0 %v994_v27 }
 0x3b3   : > { %1760 = vmatmul.msk.f32.vlgmr.msrb.gmra.mxu0 %vm1105_vm11, %v2423_v38  ;;  %v962_v38 = vpop.permute.xlu1 %961 }
 0x3b7   : > { %v996_v29 = vpop.f32.mrf.mxu3 }
 0x3b8   : > { %v997_v31 = vadd.f32 %v996_v29, %v952_v28 }
 0x3b9   : > { %v2542_v46 = vpop.f32.mrf.mxu1 }
 0x3ba   : > { %1212 = vmatpush.msrb.mxu1 %v997_v31 }
 0x3bb   : > { %1761 = vmatmul.msk.f32.gmra.mxu0 %vm1105_vm11, %v1103_v4  ;;  %1765 = vmatmul.msk.f32.vlgmr.msrb.gmra.mxu1 %vm1105_vm11, %v1190_v32 }
 0x3bf   : > { %v999_v34 = vpop.f32.mrf.mxu3 }
 0x3c0   : > { %v1000_v37 = vadd.f32 %v999_v34, %v957_v30  ;;  %v1010_v30 = vld [vmem:[%s2677_s14 + $0x8] sm:$0xff]  ;;  %v1012_v34 = vld [vmem:[%s2677_s14 + $0x18] sm:$0xff] }
 0x3c1   : > { %v2544_v47 = vpop.f32.mrf.mxu1 }
 0x3c2   : > { %1297 = vmatpush.msrb.mxu2 %v1000_v37 }
 0x3c3   : > { %1766 = vmatmul.msk.f32.gmra.mxu1 %vm1105_vm11, %v1192_v36  ;;  %1770 = vmatmul.msk.f32.vlgmr.msrb.gmra.mxu2 %vm1105_vm11, %v1275_v33  ;;  %v1011_v33 = vld [vmem:[%s2677_s14 + $0x10] sm:$0xff] }
 0x3c7   : > { %v1002_v40 = vpop.f32.mrf.mxu3 }
 0x3c8   : > { %v1003_v41 = vadd.f32 %v1002_v40, %v962_v38 }
 0x3ca   : > { %1382 = vmatpush.msra.mxu1 %v1003_v41 }
 0x3cb   : > { %1771 = vmatmul.msk.f32.gmra.mxu2 %vm1105_vm11, %v1277_v39  ;;  %1775 = vmatmul.msk.f32.vlgmr.msra.gmra.mxu1 %vm1105_vm11, %v1360_v42 }
 0x3d3   : > { %1776 = vmatmul.msk.f32.gmra.mxu1 %vm1105_vm11, %v1362_v43 }
 0x430   : > { %v1129_v48 = vpop.f32.mrf.mxu0 }
 0x431   : > { %v1135_v49 = vsel %vm821_vm6, %v1129_v48, -inf }
 0x432   : > { %1136 = vmax.xlane.f32.xlu1 %v1135_v49 }
 0x438   : > { %v1132_v50 = vpop.f32.mrf.mxu0  ;;  %v1214_v51 = vpop.f32.mrf.mxu1 }
 0x439   : > { %v1220_v52 = vsel %vm821_vm6, %v1214_v51, -inf  ;;  %v1138_v53 = vsel %vm821_vm6, %v1132_v50, -inf }
 0x43a   : > { %1221 = vmax.xlane.f32.xlu2 %v1220_v52  ;;  %1139 = vmax.xlane.f32.xlu0 %v1138_v53 }
 0x440   : > { %v1217_v54 = vpop.f32.mrf.mxu1 }
 0x441   : > { %v1223_v55 = vsel %vm821_vm6, %v1217_v54, -inf }
 0x442   : > { %1224 = vmax.xlane.f32.xlu2 %v1223_v55 }
 0x446   : > { %v1299_v56 = vpop.f32.mrf.mxu2 }
 0x447   : > { %v1305_v57 = vsel %vm821_vm6, %v1299_v56, -inf }
 0x448   : > { %v1384_v58 = vpop.f32.mrf.mxu1  ;;  %1306 = vmax.xlane.f32.xlu1 %v1305_v57 }
 0x449   : > { %v1390_v59 = vsel %vm821_vm6, %v1384_v58, -inf }
 0x44a   : > { %1391 = vmax.xlane.f32.xlu2 %v1390_v59 }
 0x44e   : > { %v1302_v60 = vpop.f32.mrf.mxu2 }
 0x44f   : > { %v1308_v0 = vsel %vm821_vm6, %v1302_v60, -inf }
 0x450   : > { %v1387_v1 = vpop.f32.mrf.mxu1  ;;  %1309 = vmax.xlane.f32.xlu0 %v1308_v0 }
 0x451   : > { %v1393_v2 = vsel %vm821_vm6, %v1387_v1, -inf }
 0x452   : > { %1394 = vmax.xlane.f32.xlu1 %v1393_v2 }
 0x464   : > { %1015 = vperm.xlu0 %1891, %v1009_v3  }
 0x4a5   : > { %v1137_v4 = vpop.xlane.xlu1 %1136 }
 0x4a6   : > { %v1141_v5 = vsub.f32 %v1129_v48, %v1137_v4 }
 0x4a8   : > { %v1143_v6 = vmul.f32 1.442695, %v1141_v5 }
 0x4aa   : > { %1900 = vpow2.f32 %v1143_v6 }
 0x4ad   : > { %v1222_v7 = vpop.xlane.xlu2 %1221  ;;  %v1140_v8 = vpop.xlane.xlu0 %1139 }
 0x4ae   : > { %v1226_v10 = vsub.f32 %v1214_v51, %v1222_v7  ;;  %v1142_v11 = vsub.f32 %v1132_v50, %v1140_v8 }
 0x4b0   : > { %v2557_v12 = vpop.eup %1900  ;;  %v1228_v13 = vmul.f32 1.442695, %v1226_v10  ;;  %v1145_v14 = vmul.f32 1.442695, %v1142_v11 }
 0x4b1   : > { %v1147_v15 = vsel %vm821_vm6, %v2557_v12, 0.0 }
 0x4b2   : > { %1902 = vpow2.f32 %v1228_v13  ;;  %1148 = vadd.xlane.f32.xlu2 %v1147_v15 }
 0x4b3   : > { %1904 = vpow2.f32 %v1145_v14 }
 0x4b5   : > { %v1225_v16 = vpop.xlane.xlu2 %1224 }
 0x4b6   : > { %v1227_v35 = vsub.f32 %v1217_v54, %v1225_v16 }
 0x4b8   : > { %v2561_v17 = vpop.eup %1902  ;;  %v1230_v18 = vmul.f32 1.442695, %v1227_v35 }
 0x4b9   : > { %v1905_v19 = vpop.eup %1904  ;;  %v1232_v20 = vsel %vm821_vm6, %v2561_v17, 0.0 }
 0x4ba   : > { %1906 = vpow2.f32 %v1230_v18  ;;  %1233 = vadd.xlane.f32.xlu1 %v1232_v20  ;;  %v1150_v21 = vsel %vm821_vm6, %v1905_v19, 0.0 }
 0x4bb   : > { %1151 = vadd.xlane.f32.xlu2 %v1150_v21  ;;  %v1307_v22 = vpop.xlane.xlu1 %1306 }
 0x4bc   : > { %v1311_v23 = vsub.f32 %v1299_v56, %v1307_v22  ;;  %v1528_v22 = vld [vmem:[#allocation7] sm:$0xff] }
 0x4bd   : > { %v1392_v36 = vpop.xlane.xlu2 %1391 }
 0x4be   : > { %v1313_v24 = vmul.f32 1.442695, %v1311_v23  ;;  %v1396_v37 = vsub.f32 %v1384_v58, %v1392_v36 }
 0x4c0   : > { %v2566_v25 = vpop.eup %1906  ;;  %1908 = vpow2.f32 %v1313_v24  ;;  %v1398_v39 = vmul.f32 1.442695, %v1396_v37  ;;  %v1562_v37 = vld [vmem:[%s2679_s16] sm:$0xff] }
 0x4c1   : > { %v1235_v26 = vsel %vm821_vm6, %v2566_v25, 0.0  ;;  %1584 = vmatpush.msrb.mxu1 %v1562_v37 }
 0x4c2   : > { %1910 = vpow2.f32 %v1398_v39 }
 0x4c3   : > { %1236 = vadd.xlane.f32.xlu2 %v1235_v26  ;;  %v1310_v29 = vpop.xlane.xlu0 %1309 }
 0x4c4   : > { %v1312_v40 = vsub.f32 %v1302_v60, %v1310_v29 }
 0x4c5   : > { %v1395_v38 = vpop.xlane.xlu1 %1394 }
 0x4c6   : > { %v1909_v27 = vpop.eup %1908  ;;  %v1397_v41 = vsub.f32 %v1387_v1, %v1395_v38  ;;  %v1315_v42 = vmul.f32 1.442695, %v1312_v40 }
 0x4c7   : > { %v1317_v28 = vsel %vm821_vm6, %v1909_v27, 0.0 }
 0x4c8   : > { %1318 = vadd.xlane.f32.xlu0 %v1317_v28  ;;  %v1400_v43 = vmul.f32 1.442695, %v1397_v41  ;;  %1912 = vpow2.f32 %v1315_v42 }
 0x4ca   : > { %1914 = vpow2.f32 %v1400_v43 }
 0x4d3   : > { %1020 = vperm.xlu1 %1892, %v1010_v30  }
 0x4d6   : > { %v1016_v31 = vpop.permute.xlu0 %1015 }
 0x4d7   : > { %v1063_v32 = vadd.f32 %v2538_v44, %v1016_v31  ;;  %v1911_v44 = vpop.eup %1910  ;;  %v1478_v31 = vld [vmem:[#allocation8 + $0x18] sm:$0xff] }
 0x4d8   : > { %v1402_v48 = vsel %vm821_vm6, %v1911_v44, 0.0  ;;  %v1913_v49 = vpop.eup %1912  ;;  %1501 = vmatpush.msra.mxu2 %v1478_v31 }
 0x4d9   : > { %1762 = vmatpush.xpose.msk.msrb.mxu3 %vm821_vm6, %v1063_v32  ;;  %v1915_v50 = vpop.eup %1914  ;;  %v1320_v51 = vsel %vm821_vm6, %v1913_v49, 0.0  ;;  %v1477_v32 = vld [vmem:[#allocation8 + $0x10] sm:$0xff] }
 0x4da   : > { %1502 = vmatpush.msra.mxu2 %v1477_v32 }
 0x4db   : > { %1025 = vperm.xlu2 %1893, %v1011_v33   ;;  %v1476_v33 = vld [vmem:[#allocation8 + $0x8] sm:$0xff] }
 0x4dc   : > { %1030 = vperm.xlu0 %1891, %v1012_v34   ;;  %1503 = vmatpush.msra.mxu2 %v1476_v33  ;;  %v1475_v34 = vld [vmem:[#allocation8] sm:$0xff] }
 0x4de   : > { %1504 = vmatpush.msra.mxu2 %v1475_v34 }
 0x4e4   : > { %1513 = vrot.lane.b32.xlu0 %v2469_v61, %s2143_s22  ;;  %v1405_v61 = vsel %vm821_vm6, %v1915_v50, 0.0 }
 0x4fd   : > { %1403 = vadd.xlane.f32.xlu1 %v1402_v48 }
 0x504   : > { %1321 = vadd.xlane.f32.xlu2 %v1320_v51 }
 0x505   : > { %1406 = vadd.xlane.f32.xlu1 %v1405_v61 }
 0x51c   : > { %1521 = vrot.lane.b32.xlu2 %v2481_v9, %s2144_s30  ;;  %s2719_s30 = sld [smem:[#allocation28_spill]] }
 0x51e   : > { %1517 = vrot.lane.b32.xlu1 %v2473_v63, %s2145_s25 }
 0x522   : > { %s1608_s28 = scalar_lea.hbm %s2719_s30, %s1793_s26 }
 0x523   : > { %s1611_s23 = sshll.u32 %s1608_s28, 4  ;;  %s1612_s23 = int_to_ptr.hbm [resolvable:$true] %s1611_s23 }
 0x524   : > { %s2066_s29 = sshra.s32 %s1612_s23, 4  ;;  %s2067_s29 = int_to_ptr.hbm [resolvable:$true] %s2066_s29 }
 0x525   : > { %v1149_v52 = vpop.xlane.xlu2 %1148  ;;  %s2068_s27 = scalar_lea.hbm %s2067_s29, 16 }
 0x526   : > { %1916 = vrcp.f32 %v1149_v52  ;;  %p2069_p0 = scmp.ne.s32.totalorder %s2067_s29, %s2068_s27 }
 0x528   : > { %p2070_p1 = pnand %p2069_p0, %p2282_p5 }
 0x52a   : > { %p2071_p2 = pneg %p2070_p1 }
 0x52c   : > { %v1917_v53 = vpop.eup %1916 }
 0x52d   : > { %v1155_v54 = vmul.f32 %v1917_v53, %v2557_v12  ;;  %v1234_v9 = vpop.xlane.xlu1 %1233  ;;  %v1895_v53 = vld [vmem:[%s2718_s19] ss:$0 sm:$0xff] }
 0x52e   : > { %v1152_v55 = vpop.xlane.xlu2 %1151 }
 0x52f   : > { %1918 = vrcp.f32 %v1152_v55  ;;  %1763 = vmatmul.msk.f32.vlgmr.msrb.gmra.mxu3 %vm821_vm6, %v1155_v54 }
 0x535   : > { %v1919_v56 = vpop.eup %1918 }
 0x536   : > { %v1237_v57 = vpop.xlane.xlu2 %1236  ;;  %v1156_v58 = vmul.f32 %v1919_v56, %v1905_v19 }
 0x538   : > { %1764 = vmatmul.msk.f32.gmra.mxu3 %vm821_vm6, %v1156_v58 }
 0x53b   : > { %v1319_v59 = vpop.xlane.xlu0 %1318 }
 0x53c   : > { %1920 = vrcp.f32 %v1319_v59 }
 0x53d   : > { %1922 = vrcp.f32 %v1234_v9 }
 0x53e   : > { %v1026_v60 = vpop.permute.xlu2 %1025  ;;  %1924 = vrcp.f32 %v1237_v57 }
 0x53f   : > { %v1069_v63 = vadd.f32 %v2542_v46, %v1026_v60 }
 0x541   : > { %1772 = vmatpush.xpose.msk.msra.mxu3 %vm821_vm6, %v1069_v63 }
 0x542   : > { %v1921_v0 = vpop.eup %1920 }
 0x543   : > { %v1325_v1 = vmul.f32 %v1921_v0, %v1909_v27  ;;  %v1923_v3 = vpop.eup %1922 }
 0x544   : > { %v1240_v5 = vmul.f32 %v1923_v3, %v2561_v17  ;;  %v1925_v6 = vpop.eup %1924 }
 0x545   : > { %v1021_v2 = vpop.permute.xlu1 %1020  ;;  %1773 = vmatmul.msk.f32.vlgmr.msra.gmra.mxu3 %vm821_vm6, %v1325_v1  ;;  %v1241_v8 = vmul.f32 %v1925_v6, %v2566_v25 }
 0x546   : > { %v1066_v4 = vadd.f32 %v2540_v45, %v1021_v2 }
 0x548   : > { %1767 = vmatpush.xpose.msk.msra.mxu0 %vm821_vm6, %v1066_v4 }
 0x54b   : > { %1768 = vmatmul.msk.f32.vlgmr.msra.gmra.mxu0 %vm821_vm6, %v1240_v5 }
 0x54e   : > { %v1031_v46 = vpop.permute.xlu0 %1030 }
 0x54f   : > { %v1072_v7 = vadd.f32 %v2544_v47, %v1031_v46 }
 0x551   : > { %1777 = vmatpush.xpose.msk.msrb.mxu0 %vm821_vm6, %v1072_v7 }
 0x553   : > { %1769 = vmatmul.msk.f32.gmra.mxu0 %vm821_vm6, %v1241_v8 }
 0x556   : > { %v1514_v35 = vpop.permute.xlu0 %1513 }
 0x557   : > { %v1524_v17 = vsel %vm821_vm6, %v2471_v62, %v1514_v35  ;;  %v1529_v62 = vld [vmem:[#allocation7 + $0x8] sm:$0xff] }
 0x570   : > { %v1404_v10 = vpop.xlane.xlu1 %1403 }
 0x571   : > { %1926 = vrcp.f32 %v1404_v10 }
 0x577   : > { %v1927_v45 = vpop.eup %1926  ;;  %v1322_v11 = vpop.xlane.xlu2 %1321 }
 0x578   : > { %v1410_v12 = vmul.f32 %v1927_v45, %v1911_v44  ;;  %1928 = vrcp.f32 %v1322_v11  ;;  %v1407_v13 = vpop.xlane.xlu1 %1406 }
 0x579   : > { %1930 = vrcp.f32 %v1407_v13 }
 0x57a   : > { %1778 = vmatmul.msk.f32.vlgmr.msrb.gmra.mxu0 %vm821_vm6, %v1410_v12 }
 0x57e   : > { %v1929_v14 = vpop.eup %1928 }
 0x57f   : > { %v1931_v15 = vpop.eup %1930  ;;  %v1326_v16 = vmul.f32 %v1929_v14, %v1913_v49  ;;  %v1522_v19 = vpop.permute.xlu2 %1521 }
 0x580   : > { %v1411_v47 = vmul.f32 %v1931_v15, %v1915_v50 }
 0x581   : > { %1774 = vmatmul.msk.f32.gmra.mxu3 %vm821_vm6, %v1326_v16 }
 0x582   : > { %1779 = vmatmul.msk.f32.gmra.mxu0 %vm821_vm6, %v1411_v47 }
 0x590   : > { %v1518_v18 = vpop.permute.xlu1 %1517 }
 0x591   : > { %v1525_v20 = vsel %vm1105_vm11, %v1524_v17, %v1518_v18 }
 0x592   : > { %v1527_v21 = vsel %vm1526_vm12, %v1525_v20, %v1522_v19 }
 0x593   : > { %1782 = vmatpush.xpose.msk.msrb.mxu3 %vm679_vm1, %v1527_v21 }
 0x596   : > { %1783 = vmatmul.msk.f32.vlgmr.msrb.gmra.mxu3 %vm679_vm1, %v1528_v22 }
 0x59e   : > { %1784 = vmatmul.msk.f32.gmra.mxu3 %vm679_vm1, %v1529_v62 }
 0x5b2   : > { %v1183_v23 = vpop.f32.mrf.mxu3 }
 0x5bb   : > { %v1186_v24 = vpop.f32.mrf.mxu3 }
 0x5c8   : > { %v1268_v25 = vpop.f32.mrf.mxu0  ;;  %v1353_v26 = vpop.f32.mrf.mxu3 }
 0x5c9   : > { %1446 = vrot.lane.b32.xlu0 %v1268_v25, %s2145_s25 }
 0x5d0   : > { %v1271_v27 = vpop.f32.mrf.mxu0 }
 0x5d1   : > { %1448 = vrot.lane.b32.xlu1 %v1271_v27, %s2145_s25  ;;  %1454 = vrot.lane.b32.xlu0 %v1353_v26, %s2146_s3 }
 0x5f7   : > { %v1438_v28 = vpop.f32.mrf.mxu0 }
 0x5f8   : > { %1462 = vrot.lane.b32.xlu0 %v1438_v28, %s2147_s18 }
 0x5ff   : > { %v1441_v29 = vpop.f32.mrf.mxu0 }
 0x600   : > { %1464 = vrot.lane.b32.xlu0 %v1441_v29, %s2147_s18 }
 0x604   : > { %v1356_v30 = vpop.f32.mrf.mxu3 }
 0x605   : > { %1456 = vrot.lane.b32.xlu2 %v1356_v30, %s2146_s3  ;;  %s2720_s3 = smov %s2719_s30 }
 0x606   : > { %s2072_s26 = scalar_lea.hbm %s2720_s3, 32  ;;  %p2073_p3 = scmp.lt.s32.totalorder %s2067_s29, %s2720_s3 }
 0x607   : > { %p2074_p4 = scmp.lt.s32.totalorder %s2072_s26, %s2068_s27 }
 0x609   : > { %p2075_p7 = por %p2074_p4, %p2073_p3 }
 0x60b   : > { %p2076_p8 = pnand %p2075_p7, %p2071_p2 }
 0x619   : > { %v1556_v36 = vpop.f32.mrf.mxu3 }
 0x61a   : > { %1785 = vmatmul.msk.f32.vlgmr.msrb.gmra.mxu1 %vm1105_vm11, %v1556_v36 }
 0x621   : > { %v1559_v38 = vpop.f32.mrf.mxu3 }
 0x622   : > { %1786 = vmatmul.msk.f32.gmra.mxu1 %vm1105_vm11, %v1559_v38 }
 0x63b   : > { %v1447_v39 = vpop.permute.xlu0 %1446 }
 0x63c   : > { %v1468_v41 = vsel %vm1105_vm11, %v1183_v23, %v1447_v39 }
 0x643   : > { %v1455_v40 = vpop.permute.xlu0 %1454  ;;  %v1449_v48 = vpop.permute.xlu1 %1448 }
 0x644   : > { %v1470_v42 = vsel %vm679_vm1, %v1468_v41, %v1455_v40  ;;  %v1469_v50 = vsel %vm1105_vm11, %v1186_v24, %v1449_v48 }
 0x65f   : > { %v1457_v49 = vpop.permute.xlu2 %1456 }
 0x660   : > { %v1471_v51 = vsel %vm679_vm1, %v1469_v50, %v1457_v49 }
 0x66a   : > { %v1463_v43 = vpop.permute.xlu0 %1462 }
 0x66b   : > { %v1473_v44 = vsel %vm1472_vm13, %v1470_v42, %v1463_v43 }
 0x66c   : > { %1780 = vmatmul.msk.f32.vlgmr.msra.gmra.mxu2 %vm646_vm0, %v1473_v44 }
 0x672   : > { %v1465_v61 = vpop.permute.xlu0 %1464 }
 0x673   : > { %v1474_v52 = vsel %vm1472_vm13, %v1471_v51, %v1465_v61 }
 0x674   : > { %1781 = vmatmul.msk.f32.gmra.mxu2 %vm646_vm0, %v1474_v52 }
 0x697   : > { %v1586_v54 = vpop.f32.mrf.mxu1 }
 0x69f   : > { %v1589_v59 = vpop.f32.mrf.mxu1 }
 0x6ef   : > { %v1506_v55 = vpop.f32.mrf.mxu2 }
 0x6f0   : > { %v1507_v56 = vadd.f32 %v1895_v53, %v1506_v55 }
 0x6f2   : > { %v1592_v57 = vadd.f32 %v1586_v54, %v1507_v56 }
 0x6f4   : > { %1594 = vst.msk [vmem:[%s631_s20] sm:$0xff] %vm646_vm0, %v1592_v57 }
 0x6f7   : > { %v1509_v58 = vpop.f32.mrf.mxu2 }
 0x6f8   : > { %v1510_v9 = vadd.f32 %v1895_v53, %v1509_v58 }
 0x6fa   : > { %v1593_v60 = vadd.f32 %v1589_v59, %v1510_v9 }
 0x6fc   : > { %1595 = vst.msk [vmem:[%s631_s20 + $0x8] sm:$0xff] %vm646_vm0, %v1593_v60 }
 0x6fd   : > { %2079 = shalt.err (!%p2076_p8)
}
 0x6fe   : > { %s2148_s24 = smov 128  }
 0x6ff   : > { %1810 = dma.vmem_to_hbm [thread:$0]  (%p2282_p5), %s1610_s2, 256, %s1612_s23, %s1597_s0, %s2148_s24, %s2148_s24, %s2145_s25  }
 0x700 PF: > { %s2722_s20 = sld [smem:[#allocation18_spill]] }
 0x701   : > { %s2723_s30 = sld [smem:[#allocation15_spill]] }
 0x706   : > { %p1837_p9 = scmp.ge.s32.totalorder %s2722_s20, 2 }
 0x707   : > { %s1626_s19 = sand.u32 1, %s2723_s30  }
 0x708   : > { %p1826_p10 = pnand %p1837_p9, %p2286_p6  ;;  %s1627_s21 = scalar_lea.sflag [#allocation4], %s1626_s19 }
 0x70a   : > { %p1827_p11 = pneg %p1826_p10 }
 0x70c   : > { %2109 = dma.done.wait (%p1827_p11), %s1627_s21, 256  }
 0x70d   : > { %2111 = vsyncadd (%p1827_p11), %s1627_s21, 4294967040  ;;  %s2725_s30 = sld [smem:[#allocation19_spill]] }
 0x70e   : > { %s2726_s27 = sld [smem:[#allocation16_spill]] }
 0x70f   : > { %s2727_s28 = sld [smem:[#allocation17_spill]] }
 0x710   : > { %s2728_s29 = sld [smem:[#allocation20_spill]] }
 0x713   : > { %p31_p12 = scmp.ge.s32.totalorder %s2725_s30, 4  }
 0x715   :  { %33 = sbr.rel (!%p31_p12) target bundleno = 13 (0xd), region = 144 }
 0x71a   :  { %1633 = vsyncpa [#allocation3], 1 }
 0x71b   :  { %1635 = vsyncpa [#allocation3 + $0x1], 1 }
 0x71c   :  { %1636 = vsyncpa [#allocation6], 1 }
 0x71d   :  { %1637 = vsyncpa [#allocation9], 1 }
 0x71e   :  { %1638 = vsyncpa [#allocation4], 1 }
 0x71f   :  { %1640 = vsyncpa [#allocation4 + $0x1], 1 }

</bundles_post_ra>
